<compile_context>
chip_gen: v7x
topology: tpu7x:2x2x1
jax: 0.10.0
libtpu: 0.0.40
codegen_flags: <defaults>
</compile_context>

<pallas_src>
import jax
import jax.numpy as jnp
from jax.experimental import pallas as pl
from jax.experimental.pallas import tpu as pltpu


def _make_kernel(num_heads, head_dim, q_block, causal):
    def body(x_ref, bias_ref, wq_ref, bq_ref, wk_ref, bk_ref, wv_ref, bv_ref,
             wo_ref, bo_ref, o_ref, k_s, v_s):
        qi = pl.program_id(1)
        seq_len = k_s.shape[0]

        # ---- once per batch element: K/V projections into bf16 VMEM scratch.
        @pl.when(qi == 0)
        def _():
            x_all = x_ref[0]                                         # (S, E) bf16
            k_s[...] = (jnp.dot(x_all, wk_ref[...],
                                preferred_element_type=jnp.float32)
                        + bk_ref[...]).astype(jnp.bfloat16)
            v_s[...] = (jnp.dot(x_all, wv_ref[...],
                                preferred_element_type=jnp.float32)
                        + bv_ref[...]).astype(jnp.bfloat16)

        # ---- per query block: Q projection from resident x rows (no q scratch).
        row0 = pl.multiple_of(qi * q_block, q_block)
        x_blk = x_ref[0, pl.ds(row0, q_block), :]                    # (Tq, E) bf16
        q_blk = (jnp.dot(x_blk, wq_ref[...],
                         preferred_element_type=jnp.float32)
                 + bq_ref[...]).astype(jnp.bfloat16)                 # scale pre-folded

        # ---- additive mask bias, shared across all heads.
        if causal:
            rows = row0 + jax.lax.broadcasted_iota(jnp.int32, (q_block, seq_len), 0)
            cols = jax.lax.broadcasted_iota(jnp.int32, (q_block, seq_len), 1)
            bias = jnp.where(cols <= rows, 0.0, -1e9).astype(jnp.float32)
        else:
            bias = bias_ref[0].astype(jnp.float32)                   # precomputed 0/-1e9

        # ---- per-head attention; contexts collected for one fused Wo matmul.
        ctxs = []
        for h in range(num_heads):                                   # static unroll (small H)
            lo = h * head_dim
            hi = lo + head_dim
            qh = q_blk[:, lo:hi]                                     # (Tq, Dh) bf16
            kh = k_s[:, lo:hi]                                       # static ref slice (no full load)
            vh = v_s[:, lo:hi]
            s = jnp.einsum('qd,kd->qk', qh, kh,
                           preferred_element_type=jnp.float32) + bias  # (Tq, S) f32
            m = jnp.max(s, axis=-1, keepdims=True)
            p = jnp.exp(s - m)
            l = jnp.sum(p, axis=-1, keepdims=True)
            ctx = jnp.dot(p.astype(jnp.bfloat16), vh,
                          preferred_element_type=jnp.float32)        # (Tq, Dh) f32
            ctxs.append((ctx * pl.reciprocal(l, approx=True)).astype(jnp.bfloat16))

        ctx_all = jnp.concatenate(ctxs, axis=-1)                     # (Tq, H*Dh) bf16
        out = jnp.dot(ctx_all, wo_ref[...],
                      preferred_element_type=jnp.float32) + bo_ref[...]
        o_ref[0] = out.astype(o_ref.dtype)                           # lane-dense store

    if causal:
        def kernel(x_ref, *rest):
            body(x_ref, None, *rest)
    else:
        def kernel(x_ref, bias_ref, *rest):
            body(x_ref, bias_ref, *rest)
    return kernel


def _vmem_limit_bytes():
    """~75% of physical VMEM: headroom for compiler-internal scratch, but no
    longer leaving half of v5e/v6e's 128 MiB idle (or all of v7x's 64 MiB used)."""
    try:
        cap = int(pltpu.get_tpu_info().vmem_capacity_bytes)
    except Exception:
        cap = 64 * 1024 * 1024      # conservative fallback (v7x-sized)
    return cap * 3 // 4


def multi_headed_self_attention(x, params, *, num_heads, head_dim,
                                mask=None, causal=False, q_block=128,
                                out_dtype=None):
    """x: (B, S, E). mask: (B, S, S) or (1, S, S) with 0 == masked, or causal=True.
    params: from prepare_params (bf16 weights, 1/sqrt(Dh) folded into Wq/bq)."""
    B, S, E = x.shape
    HD = num_heads * head_dim
    q_block = min(q_block, S)
    # q_block multiples of 16 are preferred for bf16 sublane packing.
    assert S % q_block == 0 and q_block % 8 == 0
    num_q_blocks = S // q_block
    if not causal and mask is None:
        raise ValueError("provide `mask` or set causal=True")
    out_dtype = x.dtype if out_dtype is None else out_dtype

    wq, bq, wk, bk, wv, bv, wo, bo = params
    kernel = _make_kernel(num_heads, head_dim, q_block, causal)

    x_bf16 = x.astype(jnp.bfloat16)      # halve streamed activation traffic / VMEM
    if not causal:
        # Precompute the additive bias once (0 / -1e9): no per-step compare+select
        # in the kernel, and exact 0/1-mask semantics regardless of mask dtype.
        bias = jnp.where(mask == 0, -1e9, 0.0).astype(jnp.bfloat16)
        mask_batched = bias.shape[0] != 1

    def build(single_buffer_weights):
        def const_spec(shape):
            idx = lambda b, qi: (0,) * len(shape)
            if single_buffer_weights:
                # Constant index_map -> fetched once; no point double-buffering.
                return pl.BlockSpec(shape, idx, pipeline_mode=pl.Buffered(1))
            return pl.BlockSpec(shape, idx)

        # x: full sequence per batch element, constant over qi -> DMA'd once per b.
        in_specs = [pl.BlockSpec((1, S, E), lambda b, qi: (b, 0, 0))]
        operands = [x_bf16]
        if not causal:
            if mask_batched:
                in_specs.append(pl.BlockSpec((1, q_block, S), lambda b, qi: (b, qi, 0)))
            else:   # broadcast mask: fetch the same block for every batch element
                in_specs.append(pl.BlockSpec((1, q_block, S), lambda b, qi: (0, qi, 0)))
            operands.append(bias)
        in_specs += [
            const_spec((E, HD)),   # Wq (1/sqrt(Dh) folded in)
            const_spec((1, HD)),   # bq (scaled)
            const_spec((E, HD)),   # Wk
            const_spec((1, HD)),   # bk
            const_spec((E, HD)),   # Wv
            const_spec((1, HD)),   # bv
            const_spec((HD, E)),   # Wo (pre-transposed)
            const_spec((1, E)),    # bo
        ]
        operands = operands + [wq, bq, wk, bk, wv, bv, wo, bo]

        return pl.pallas_call(
            kernel,
            out_shape=jax.ShapeDtypeStruct((B, S, E), out_dtype),
            grid_spec=pltpu.PrefetchScalarGridSpec(
                num_scalar_prefetch=0,
                grid=(B, num_q_blocks),
                in_specs=in_specs,
                out_specs=pl.BlockSpec((1, q_block, E), lambda b, qi: (b, qi, 0)),
                # Only K/V projections stay resident (q scratch dropped).
                scratch_shapes=[pltpu.VMEM((S, HD), jnp.bfloat16),
                                pltpu.VMEM((S, HD), jnp.bfloat16)],
            ),
            compiler_params=pltpu.CompilerParams(
                # qi must stay sequential: it refills the K/V scratch at qi == 0.
                dimension_semantics=("parallel", "arbitrary"),
                vmem_limit_bytes=_vmem_limit_bytes(),
            ),
        )(*operands)

    try:
        return build(single_buffer_weights=True)
    except Exception:
        # pipeline_mode=pl.Buffered(1) unsupported on this jax/Mosaic version;
        # fall back to default double-buffered weight specs.
        return build(single_buffer_weights=False)


def init_params(key, embed_dim, num_heads):
    """Deterministic synthetic fp32 parameters matching the PyTorch shapes."""
    head_dim = embed_dim // num_heads
    HD = num_heads * head_dim
    ks = jax.random.split(key, 8)
    scale = 0.05
    # Per-head Linear(E, Dh) weights stacked on the output dim, stored transposed
    # so the math is x @ W (== x @ W_torch.T).
    wq = scale * jax.random.normal(ks[0], (embed_dim, HD), jnp.float32)
    wk = scale * jax.random.normal(ks[1], (embed_dim, HD), jnp.float32)
    wv = scale * jax.random.normal(ks[2], (embed_dim, HD), jnp.float32)
    bq = scale * jax.random.normal(ks[3], (1, HD), jnp.float32)
    bk = scale * jax.random.normal(ks[4], (1, HD), jnp.float32)
    bv = scale * jax.random.normal(ks[5], (1, HD), jnp.float32)
    wo_t = scale * jax.random.normal(ks[6], (HD, embed_dim), jnp.float32)  # W.T of Linear(H*Dh, E)
    bo = scale * jax.random.normal(ks[7], (1, embed_dim), jnp.float32)
    return (wq, bq, wk, bk, wv, bv, wo_t, bo), head_dim


def prepare_params(params, head_dim):
    """One-time host-side transform: fold 1/sqrt(Dh) into Wq/bq and cast the
    weight matrices to bf16 (fp32 biases kept for the fp32 epilogue adds)."""
    wq, bq, wk, bk, wv, bv, wo, bo = params
    scale = 1.0 / (float(head_dim) ** 0.5)
    return ((wq * scale).astype(jnp.bfloat16), (bq * scale).astype(jnp.float32),
            wk.astype(jnp.bfloat16), bk.astype(jnp.float32),
            wv.astype(jnp.bfloat16), bv.astype(jnp.float32),
            wo.astype(jnp.bfloat16), bo.astype(jnp.float32))


def reference(x, mask, params, *, num_heads, head_dim):
    """Pure-JAX fp32 reference mirroring the PyTorch module."""
    wq, bq, wk, bk, wv, bv, wo_t, bo = params
    q = x @ wq + bq
    k = x @ wk + bk
    v = x @ wv + bv
    outs = []
    for h in range(num_heads):
        sl = slice(h * head_dim, (h + 1) * head_dim)
        s = jnp.einsum('bqd,bkd->bqk', q[..., sl], k[..., sl]) / jnp.sqrt(
            jnp.float32(head_dim))
        s = jnp.where(mask == 0, -1e9, s)
        a = jax.nn.softmax(s, axis=-1)
        outs.append(jnp.einsum('bqk,bkd->bqd', a, v[..., sl]))
    return jnp.concatenate(outs, axis=2) @ wo_t + bo


if __name__ == "__main__":
    B, S, E, H = 2, 32, 32, 4          # small demo shapes; 2 query blocks of 16

    key = jax.random.PRNGKey(0)
    k_x, k_p = jax.random.split(key)

    x = jax.random.normal(k_x, (B, S, E), jnp.float32)
    causal_mask = jnp.tril(jnp.ones((S, S), jnp.float32))
    mask_bcast = causal_mask[None]                     # (1, S, S) broadcast over batch

    params, head_dim = init_params(k_p, E, H)
    kparams = prepare_params(params, head_dim)         # one-time: bf16 + scale folding

    # Path 1: causal mask generated in-kernel (no mask DMA at all).
    out_causal = multi_headed_self_attention(
        x, kparams, num_heads=H, head_dim=head_dim, causal=True, q_block=16)
    # Path 2: arbitrary mask streamed as a compact additive bf16 bias,
    # de-duplicated across batch (broadcast (1, S, S) mask).
    out_masked = multi_headed_self_attention(
        x, kparams, num_heads=H, head_dim=head_dim, mask=mask_bcast, q_block=16)
    out_causal, out_masked = jax.block_until_ready((out_causal, out_masked))

    ref = reference(x, mask_bcast, params, num_heads=H, head_dim=head_dim)
    assert out_causal.shape == (B, S, E)
    assert out_masked.shape == (B, S, E)
    # bf16 matmul operands + approx reciprocal -> looser tolerance than pure fp32.
    assert jnp.allclose(out_causal, ref, atol=2e-2, rtol=2e-2), "causal path mismatch"
    assert jnp.allclose(out_masked, ref, atol=2e-2, rtol=2e-2), "masked path mismatch"

    print("KERNEL_OK")
</pallas_src>

<mosaic_0001>
module attributes {stable_mosaic.version = 11 : i64} {
  func.func @kernel(%arg0: i32, %arg1: i32, %arg2: memref<1x32x32xbf16, #tpu.memory_space<vmem>>, %arg3: memref<32x32xbf16, #tpu.memory_space<vmem>>, %arg4: memref<1x32xf32, #tpu.memory_space<vmem>>, %arg5: memref<32x32xbf16, #tpu.memory_space<vmem>>, %arg6: memref<1x32xf32, #tpu.memory_space<vmem>>, %arg7: memref<32x32xbf16, #tpu.memory_space<vmem>>, %arg8: memref<1x32xf32, #tpu.memory_space<vmem>>, %arg9: memref<32x32xbf16, #tpu.memory_space<vmem>>, %arg10: memref<1x32xf32, #tpu.memory_space<vmem>>, %arg11: memref<1x16x32xf32, #tpu.memory_space<vmem>>, %arg12: memref<32x32xbf16, #tpu.memory_space<vmem>>, %arg13: memref<32x32xbf16, #tpu.memory_space<vmem>>) attributes {dimension_semantics = [#tpu.dimension_semantics<parallel>, #tpu.dimension_semantics<arbitrary>], iteration_bounds = array<i64: 2, 2>, scalar_prefetch = 0 : i64, scratch_operands = 2 : i64, tpu.core_type = #tpu.core_type<tc>, window_params = [{transform_indices = @transform_0, window_bounds = array<i64: 1, 32, 32>}, {pipeline_mode = #tpu.pipeline_mode<synchronous>, transform_indices = @transform_1, window_bounds = array<i64: 32, 32>}, {pipeline_mode = #tpu.pipeline_mode<synchronous>, transform_indices = @transform_2, window_bounds = array<i64: 1, 32>}, {pipeline_mode = #tpu.pipeline_mode<synchronous>, transform_indices = @transform_3, window_bounds = array<i64: 32, 32>}, {pipeline_mode = #tpu.pipeline_mode<synchronous>, transform_indices = @transform_4, window_bounds = array<i64: 1, 32>}, {pipeline_mode = #tpu.pipeline_mode<synchronous>, transform_indices = @transform_5, window_bounds = array<i64: 32, 32>}, {pipeline_mode = #tpu.pipeline_mode<synchronous>, transform_indices = @transform_6, window_bounds = array<i64: 1, 32>}, {pipeline_mode = #tpu.pipeline_mode<synchronous>, transform_indices = @transform_7, window_bounds = array<i64: 32, 32>}, {pipeline_mode = #tpu.pipeline_mode<synchronous>, transform_indices = @transform_8, window_bounds = array<i64: 1, 32>}, {transform_indices = @transform_9, window_bounds = array<i64: 1, 16, 32>}]} {
    %c0_i32 = arith.constant 0 : i32
    %0 = arith.cmpi eq, %arg1, %c0_i32 : i32
    %1 = arith.extui %0 : i1 to i32
    %c0_i32_0 = arith.constant 0 : i32
    %2 = arith.cmpi ne, %1, %c0_i32_0 : i32
    scf.if %2 {
      %c0_45 = arith.constant 0 : index
      %c0_46 = arith.constant 0 : index
      %c0_47 = arith.constant 0 : index
      %103 = vector.load %arg2[%c0_45, %c0_46, %c0_47] : memref<1x32x32xbf16, #tpu.memory_space<vmem>>, vector<1x32x32xbf16>
      %104 = vector.shape_cast %103 : vector<1x32x32xbf16> to vector<32x32xbf16>
      %c0_48 = arith.constant 0 : index
      %c0_49 = arith.constant 0 : index
      %105 = vector.load %arg5[%c0_48, %c0_49] : memref<32x32xbf16, #tpu.memory_space<vmem>>, vector<32x32xbf16>
      %cst_50 = arith.constant dense<0.000000e+00> : vector<32x32xf32>
      %106 = tpu.matmul %104, %105, %cst_50 {dimension_numbers = #tpu.dot_dimension_numbers<[1], [0], [0], [1], [0, 0, 1, 1], [], []>} : vector<32x32xbf16>, vector<32x32xbf16>, vector<32x32xf32> -> vector<32x32xf32>
      %c0_51 = arith.constant 0 : index
      %c0_52 = arith.constant 0 : index
      %107 = vector.load %arg6[%c0_51, %c0_52] : memref<1x32xf32, #tpu.memory_space<vmem>>, vector<1x32xf32>
      %108 = vector.broadcast %107 : vector<1x32xf32> to vector<32x32xf32>
      %109 = arith.addf %106, %108 : vector<32x32xf32>
      %110 = arith.truncf %109 : vector<32x32xf32> to vector<32x32xbf16>
      %c0_53 = arith.constant 0 : index
      %c0_54 = arith.constant 0 : index
      %111 = vector.load %arg12[%c0_53, %c0_54] : memref<32x32xbf16, #tpu.memory_space<vmem>>, vector<32x32xbf16>
      tpu.vector_store %arg12[%c0_53, %c0_54], %110 {strides = array<i32>} : memref<32x32xbf16, #tpu.memory_space<vmem>>, vector<32x32xbf16>,
      %c0_55 = arith.constant 0 : index
      %c0_56 = arith.constant 0 : index
      %112 = vector.load %arg7[%c0_55, %c0_56] : memref<32x32xbf16, #tpu.memory_space<vmem>>, vector<32x32xbf16>
      %cst_57 = arith.constant dense<0.000000e+00> : vector<32x32xf32>
      %113 = tpu.matmul %104, %112, %cst_57 {dimension_numbers = #tpu.dot_dimension_numbers<[1], [0], [0], [1], [0, 0, 1, 1], [], []>} : vector<32x32xbf16>, vector<32x32xbf16>, vector<32x32xf32> -> vector<32x32xf32>
      %c0_58 = arith.constant 0 : index
      %c0_59 = arith.constant 0 : index
      %114 = vector.load %arg8[%c0_58, %c0_59] : memref<1x32xf32, #tpu.memory_space<vmem>>, vector<1x32xf32>
      %115 = vector.broadcast %114 : vector<1x32xf32> to vector<32x32xf32>
      %116 = arith.addf %113, %115 : vector<32x32xf32>
      %117 = arith.truncf %116 : vector<32x32xf32> to vector<32x32xbf16>
      %c0_60 = arith.constant 0 : index
      %c0_61 = arith.constant 0 : index
      %118 = vector.load %arg13[%c0_60, %c0_61] : memref<32x32xbf16, #tpu.memory_space<vmem>>, vector<32x32xbf16>
      tpu.vector_store %arg13[%c0_60, %c0_61], %117 {strides = array<i32>} : memref<32x32xbf16, #tpu.memory_space<vmem>>, vector<32x32xbf16>,
    } else {
    }
    %c16_i32 = arith.constant 16 : i32
    %3 = arith.muli %arg1, %c16_i32 : i32
    %4 = tpu.assume_multiple %3, 16 : i32
    %c0 = arith.constant 0 : index
    %5 = arith.index_cast %4 : i32 to index
    %c0_1 = arith.constant 0 : index
    %6 = vector.load %arg2[%c0, %5, %c0_1] : memref<1x32x32xbf16, #tpu.memory_space<vmem>>, vector<1x16x32xbf16>
    %7 = vector.shape_cast %6 : vector<1x16x32xbf16> to vector<16x32xbf16>
    %c0_2 = arith.constant 0 : index
    %c0_3 = arith.constant 0 : index
    %8 = vector.load %arg3[%c0_2, %c0_3] : memref<32x32xbf16, #tpu.memory_space<vmem>>, vector<32x32xbf16>
    %cst = arith.constant dense<0.000000e+00> : vector<16x32xf32>
    %9 = tpu.matmul %7, %8, %cst {dimension_numbers = #tpu.dot_dimension_numbers<[1], [0], [0], [1], [0, 0, 1, 1], [], []>} : vector<16x32xbf16>, vector<32x32xbf16>, vector<16x32xf32> -> vector<16x32xf32>
    %c0_4 = arith.constant 0 : index
    %c0_5 = arith.constant 0 : index
    %10 = vector.load %arg4[%c0_4, %c0_5] : memref<1x32xf32, #tpu.memory_space<vmem>>, vector<1x32xf32>
    %11 = vector.broadcast %10 : vector<1x32xf32> to vector<16x32xf32>
    %12 = arith.addf %9, %11 : vector<16x32xf32>
    %13 = arith.truncf %12 : vector<16x32xf32> to vector<16x32xbf16>
    %14 = tpu.iota {dimensions = array<i32: 0>} : vector<16x32xi32>
    %15 = vector.broadcast %4 : i32 to vector<16x32xi32>
    %16 = arith.addi %15, %14 : vector<16x32xi32>
    %17 = tpu.iota {dimensions = array<i32: 1>} : vector<16x32xi32>
    %18 = arith.cmpi sle, %17, %16 : vector<16x32xi32>
    %cst_6 = arith.constant 0.000000e+00 : f32
    %cst_7 = arith.constant -1.000000e+09 : f32
    %19 = vector.broadcast %cst_6 : f32 to vector<16x32xf32>
    %20 = vector.broadcast %cst_7 : f32 to vector<16x32xf32>
    %21 = arith.select %18, %19, %20 : vector<16x32xi1>, vector<16x32xf32>
    %22 = vector.extract_strided_slice %13 {offsets = [0, 0], sizes = [16, 8], strides = [1, 1]} : vector<16x32xbf16> to vector<16x8xbf16>
    %c0_8 = arith.constant 0 : index
    %c0_9 = arith.constant 0 : index
    %23 = vector.load %arg12[%c0_8, %c0_9] : memref<32x32xbf16, #tpu.memory_space<vmem>>, vector<32x8xbf16>
    %c0_10 = arith.constant 0 : index
    %c0_11 = arith.constant 0 : index
    %24 = vector.load %arg13[%c0_10, %c0_11] : memref<32x32xbf16, #tpu.memory_space<vmem>>, vector<32x8xbf16>
    "tpu.trace_start"() <{level = 10 : i32, message = "qd,kd->qk"}> : () -> ()
    %cst_12 = arith.constant dense<0.000000e+00> : vector<16x32xf32>
    %25 = tpu.matmul %22, %23, %cst_12 {dimension_numbers = #tpu.dot_dimension_numbers<[1], [1], [0], [0], [0, 0, 1, 0], [], []>} : vector<16x8xbf16>, vector<32x8xbf16>, vector<16x32xf32> -> vector<16x32xf32>
    "tpu.trace_stop"() : () -> ()
    %26 = arith.addf %25, %21 : vector<16x32xf32>
    %cst_13 = arith.constant dense<0xFF800000> : vector<16xf32>
    %27 = vector.multi_reduction <maximumf>, %26, %cst_13 [1] : vector<16x32xf32> to vector<16xf32>
    %28 = vector.shape_cast %27 : vector<16xf32> to vector<16x1xf32>
    %29 = vector.broadcast %28 : vector<16x1xf32> to vector<16x32xf32>
    %30 = arith.subf %26, %29 : vector<16x32xf32>
    %31 = math.exp %30 : vector<16x32xf32>
    %cst_14 = arith.constant dense<0.000000e+00> : vector<16xf32>
    %32 = vector.multi_reduction <add>, %31, %cst_14 [1] : vector<16x32xf32> to vector<16xf32>
    %33 = vector.shape_cast %32 : vector<16xf32> to vector<16x1xf32>
    %34 = arith.truncf %31 : vector<16x32xf32> to vector<16x32xbf16>
    %cst_15 = arith.constant dense<0.000000e+00> : vector<16x8xf32>
    %35 = tpu.matmul %34, %24, %cst_15 {dimension_numbers = #tpu.dot_dimension_numbers<[1], [0], [0], [1], [0, 0, 1, 1], [], []>} : vector<16x32xbf16>, vector<32x8xbf16>, vector<16x8xf32> -> vector<16x8xf32>
    %36 = tpu.reciprocal %33 {approx = true} : vector<16x1xf32> -> vector<16x1xf32>
    %37 = vector.broadcast %36 : vector<16x1xf32> to vector<16x8xf32>
    %38 = arith.mulf %35, %37 : vector<16x8xf32>
    %39 = arith.truncf %38 : vector<16x8xf32> to vector<16x8xbf16>
    %40 = vector.extract_strided_slice %13 {offsets = [0, 8], sizes = [16, 8], strides = [1, 1]} : vector<16x32xbf16> to vector<16x8xbf16>
    %c0_16 = arith.constant 0 : index
    %c8 = arith.constant 8 : index
    %41 = vector.load %arg12[%c0_16, %c8] : memref<32x32xbf16, #tpu.memory_space<vmem>>, vector<32x8xbf16>
    %c0_17 = arith.constant 0 : index
    %c8_18 = arith.constant 8 : index
    %42 = vector.load %arg13[%c0_17, %c8_18] : memref<32x32xbf16, #tpu.memory_space<vmem>>, vector<32x8xbf16>
    "tpu.trace_start"() <{level = 10 : i32, message = "qd,kd->qk"}> : () -> ()
    %cst_19 = arith.constant dense<0.000000e+00> : vector<16x32xf32>
    %43 = tpu.matmul %40, %41, %cst_19 {dimension_numbers = #tpu.dot_dimension_numbers<[1], [1], [0], [0], [0, 0, 1, 0], [], []>} : vector<16x8xbf16>, vector<32x8xbf16>, vector<16x32xf32> -> vector<16x32xf32>
    "tpu.trace_stop"() : () -> ()
    %44 = arith.addf %43, %21 : vector<16x32xf32>
    %cst_20 = arith.constant dense<0xFF800000> : vector<16xf32>
    %45 = vector.multi_reduction <maximumf>, %44, %cst_20 [1] : vector<16x32xf32> to vector<16xf32>
    %46 = vector.shape_cast %45 : vector<16xf32> to vector<16x1xf32>
    %47 = vector.broadcast %46 : vector<16x1xf32> to vector<16x32xf32>
    %48 = arith.subf %44, %47 : vector<16x32xf32>
    %49 = math.exp %48 : vector<16x32xf32>
    %cst_21 = arith.constant dense<0.000000e+00> : vector<16xf32>
    %50 = vector.multi_reduction <add>, %49, %cst_21 [1] : vector<16x32xf32> to vector<16xf32>
    %51 = vector.shape_cast %50 : vector<16xf32> to vector<16x1xf32>
    %52 = arith.truncf %49 : vector<16x32xf32> to vector<16x32xbf16>
    %cst_22 = arith.constant dense<0.000000e+00> : vector<16x8xf32>
    %53 = tpu.matmul %52, %42, %cst_22 {dimension_numbers = #tpu.dot_dimension_numbers<[1], [0], [0], [1], [0, 0, 1, 1], [], []>} : vector<16x32xbf16>, vector<32x8xbf16>, vector<16x8xf32> -> vector<16x8xf32>
    %54 = tpu.reciprocal %51 {approx = true} : vector<16x1xf32> -> vector<16x1xf32>
    %55 = vector.broadcast %54 : vector<16x1xf32> to vector<16x8xf32>
    %56 = arith.mulf %53, %55 : vector<16x8xf32>
    %57 = arith.truncf %56 : vector<16x8xf32> to vector<16x8xbf16>
    %58 = vector.extract_strided_slice %13 {offsets = [0, 16], sizes = [16, 8], strides = [1, 1]} : vector<16x32xbf16> to vector<16x8xbf16>
    %c0_23 = arith.constant 0 : index
    %c16 = arith.constant 16 : index
    %59 = vector.load %arg12[%c0_23, %c16] : memref<32x32xbf16, #tpu.memory_space<vmem>>, vector<32x8xbf16>
    %c0_24 = arith.constant 0 : index
    %c16_25 = arith.constant 16 : index
    %60 = vector.load %arg13[%c0_24, %c16_25] : memref<32x32xbf16, #tpu.memory_space<vmem>>, vector<32x8xbf16>
    "tpu.trace_start"() <{level = 10 : i32, message = "qd,kd->qk"}> : () -> ()
    %cst_26 = arith.constant dense<0.000000e+00> : vector<16x32xf32>
    %61 = tpu.matmul %58, %59, %cst_26 {dimension_numbers = #tpu.dot_dimension_numbers<[1], [1], [0], [0], [0, 0, 1, 0], [], []>} : vector<16x8xbf16>, vector<32x8xbf16>, vector<16x32xf32> -> vector<16x32xf32>
    "tpu.trace_stop"() : () -> ()
    %62 = arith.addf %61, %21 : vector<16x32xf32>
    %cst_27 = arith.constant dense<0xFF800000> : vector<16xf32>
    %63 = vector.multi_reduction <maximumf>, %62, %cst_27 [1] : vector<16x32xf32> to vector<16xf32>
    %64 = vector.shape_cast %63 : vector<16xf32> to vector<16x1xf32>
    %65 = vector.broadcast %64 : vector<16x1xf32> to vector<16x32xf32>
    %66 = arith.subf %62, %65 : vector<16x32xf32>
    %67 = math.exp %66 : vector<16x32xf32>
    %cst_28 = arith.constant dense<0.000000e+00> : vector<16xf32>
    %68 = vector.multi_reduction <add>, %67, %cst_28 [1] : vector<16x32xf32> to vector<16xf32>
    %69 = vector.shape_cast %68 : vector<16xf32> to vector<16x1xf32>
    %70 = arith.truncf %67 : vector<16x32xf32> to vector<16x32xbf16>
    %cst_29 = arith.constant dense<0.000000e+00> : vector<16x8xf32>
    %71 = tpu.matmul %70, %60, %cst_29 {dimension_numbers = #tpu.dot_dimension_numbers<[1], [0], [0], [1], [0, 0, 1, 1], [], []>} : vector<16x32xbf16>, vector<32x8xbf16>, vector<16x8xf32> -> vector<16x8xf32>
    %72 = tpu.reciprocal %69 {approx = true} : vector<16x1xf32> -> vector<16x1xf32>
    %73 = vector.broadcast %72 : vector<16x1xf32> to vector<16x8xf32>
    %74 = arith.mulf %71, %73 : vector<16x8xf32>
    %75 = arith.truncf %74 : vector<16x8xf32> to vector<16x8xbf16>
    %76 = vector.extract_strided_slice %13 {offsets = [0, 24], sizes = [16, 8], strides = [1, 1]} : vector<16x32xbf16> to vector<16x8xbf16>
    %c0_30 = arith.constant 0 : index
    %c24 = arith.constant 24 : index
    %77 = vector.load %arg12[%c0_30, %c24] : memref<32x32xbf16, #tpu.memory_space<vmem>>, vector<32x8xbf16>
    %c0_31 = arith.constant 0 : index
    %c24_32 = arith.constant 24 : index
    %78 = vector.load %arg13[%c0_31, %c24_32] : memref<32x32xbf16, #tpu.memory_space<vmem>>, vector<32x8xbf16>
    "tpu.trace_start"() <{level = 10 : i32, message = "qd,kd->qk"}> : () -> ()
    %cst_33 = arith.constant dense<0.000000e+00> : vector<16x32xf32>
    %79 = tpu.matmul %76, %77, %cst_33 {dimension_numbers = #tpu.dot_dimension_numbers<[1], [1], [0], [0], [0, 0, 1, 0], [], []>} : vector<16x8xbf16>, vector<32x8xbf16>, vector<16x32xf32> -> vector<16x32xf32>
    "tpu.trace_stop"() : () -> ()
    %80 = arith.addf %79, %21 : vector<16x32xf32>
    %cst_34 = arith.constant dense<0xFF800000> : vector<16xf32>
    %81 = vector.multi_reduction <maximumf>, %80, %cst_34 [1] : vector<16x32xf32> to vector<16xf32>
    %82 = vector.shape_cast %81 : vector<16xf32> to vector<16x1xf32>
    %83 = vector.broadcast %82 : vector<16x1xf32> to vector<16x32xf32>
    %84 = arith.subf %80, %83 : vector<16x32xf32>
    %85 = math.exp %84 : vector<16x32xf32>
    %cst_35 = arith.constant dense<0.000000e+00> : vector<16xf32>
    %86 = vector.multi_reduction <add>, %85, %cst_35 [1] : vector<16x32xf32> to vector<16xf32>
    %87 = vector.shape_cast %86 : vector<16xf32> to vector<16x1xf32>
    %88 = arith.truncf %85 : vector<16x32xf32> to vector<16x32xbf16>
    %cst_36 = arith.constant dense<0.000000e+00> : vector<16x8xf32>
    %89 = tpu.matmul %88, %78, %cst_36 {dimension_numbers = #tpu.dot_dimension_numbers<[1], [0], [0], [1], [0, 0, 1, 1], [], []>} : vector<16x32xbf16>, vector<32x8xbf16>, vector<16x8xf32> -> vector<16x8xf32>
    %90 = tpu.reciprocal %87 {approx = true} : vector<16x1xf32> -> vector<16x1xf32>
    %91 = vector.broadcast %90 : vector<16x1xf32> to vector<16x8xf32>
    %92 = arith.mulf %89, %91 : vector<16x8xf32>
    %93 = arith.truncf %92 : vector<16x8xf32> to vector<16x8xbf16>
    %94 = tpu.concatenate %39, %57, %75, %93 in 1 : vector<16x8xbf16>, vector<16x8xbf16>, vector<16x8xbf16>, vector<16x8xbf16> -> vector<16x32xbf16>
    %c0_37 = arith.constant 0 : index
    %c0_38 = arith.constant 0 : index
    %95 = vector.load %arg9[%c0_37, %c0_38] : memref<32x32xbf16, #tpu.memory_space<vmem>>, vector<32x32xbf16>
    %cst_39 = arith.constant dense<0.000000e+00> : vector<16x32xf32>
    %96 = tpu.matmul %94, %95, %cst_39 {dimension_numbers = #tpu.dot_dimension_numbers<[1], [0], [0], [1], [0, 0, 1, 1], [], []>} : vector<16x32xbf16>, vector<32x32xbf16>, vector<16x32xf32> -> vector<16x32xf32>
    %c0_40 = arith.constant 0 : index
    %c0_41 = arith.constant 0 : index
    %97 = vector.load %arg10[%c0_40, %c0_41] : memref<1x32xf32, #tpu.memory_space<vmem>>, vector<1x32xf32>
    %98 = vector.broadcast %97 : vector<1x32xf32> to vector<16x32xf32>
    %99 = arith.addf %96, %98 : vector<16x32xf32>
    %c0_42 = arith.constant 0 : index
    %c0_43 = arith.constant 0 : index
    %c0_44 = arith.constant 0 : index
    %100 = vector.load %arg11[%c0_42, %c0_43, %c0_44] : memref<1x16x32xf32, #tpu.memory_space<vmem>>, vector<1x16x32xf32>
    %101 = vector.shape_cast %100 : vector<1x16x32xf32> to vector<16x32xf32>
    %102 = vector.shape_cast %99 : vector<16x32xf32> to vector<1x16x32xf32>
    tpu.vector_store %arg11[%c0_42, %c0_43, %c0_44], %102 {strides = array<i32>} : memref<1x16x32xf32, #tpu.memory_space<vmem>>, vector<1x16x32xf32>,
    return
  }
  func.func @transform_0(%arg0: i32, %arg1: i32) -> (i32, i32, i32) {
    %c0_i32 = arith.constant 0 : i32
    %c0_i32_0 = arith.constant 0 : i32
    %c0_i32_1 = arith.constant 0 : i32
    return %arg0, %c0_i32, %c0_i32_0 : i32, i32, i32
  }
  func.func @transform_1(%arg0: i32, %arg1: i32) -> (i32, i32) {
    %c0_i32 = arith.constant 0 : i32
    %c0_i32_0 = arith.constant 0 : i32
    %c0_i32_1 = arith.constant 0 : i32
    return %c0_i32, %c0_i32_0 : i32, i32
  }
  func.func @transform_2(%arg0: i32, %arg1: i32) -> (i32, i32) {
    %c0_i32 = arith.constant 0 : i32
    %c0_i32_0 = arith.constant 0 : i32
    %c0_i32_1 = arith.constant 0 : i32
    return %c0_i32, %c0_i32_0 : i32, i32
  }
  func.func @transform_3(%arg0: i32, %arg1: i32) -> (i32, i32) {
    %c0_i32 = arith.constant 0 : i32
    %c0_i32_0 = arith.constant 0 : i32
    %c0_i32_1 = arith.constant 0 : i32
    return %c0_i32, %c0_i32_0 : i32, i32
  }
  func.func @transform_4(%arg0: i32, %arg1: i32) -> (i32, i32) {
    %c0_i32 = arith.constant 0 : i32
    %c0_i32_0 = arith.constant 0 : i32
    %c0_i32_1 = arith.constant 0 : i32
    return %c0_i32, %c0_i32_0 : i32, i32
  }
  func.func @transform_5(%arg0: i32, %arg1: i32) -> (i32, i32) {
    %c0_i32 = arith.constant 0 : i32
    %c0_i32_0 = arith.constant 0 : i32
    %c0_i32_1 = arith.constant 0 : i32
    return %c0_i32, %c0_i32_0 : i32, i32
  }
  func.func @transform_6(%arg0: i32, %arg1: i32) -> (i32, i32) {
    %c0_i32 = arith.constant 0 : i32
    %c0_i32_0 = arith.constant 0 : i32
    %c0_i32_1 = arith.constant 0 : i32
    return %c0_i32, %c0_i32_0 : i32, i32
  }
  func.func @transform_7(%arg0: i32, %arg1: i32) -> (i32, i32) {
    %c0_i32 = arith.constant 0 : i32
    %c0_i32_0 = arith.constant 0 : i32
    %c0_i32_1 = arith.constant 0 : i32
    return %c0_i32, %c0_i32_0 : i32, i32
  }
  func.func @transform_8(%arg0: i32, %arg1: i32) -> (i32, i32) {
    %c0_i32 = arith.constant 0 : i32
    %c0_i32_0 = arith.constant 0 : i32
    %c0_i32_1 = arith.constant 0 : i32
    return %c0_i32, %c0_i32_0 : i32, i32
  }
  func.func @transform_9(%arg0: i32, %arg1: i32) -> (i32, i32, i32) {
    %c0_i32 = arith.constant 0 : i32
    %c0_i32_0 = arith.constant 0 : i32
    return %arg0, %arg1, %c0_i32 : i32, i32, i32
  }
}

module attributes {stable_mosaic.version = 11 : i64} {
  func.func @kernel(%arg0: i32, %arg1: i32, %arg2: memref<1x32x32xbf16, #tpu.memory_space<vmem>>, %arg3: memref<32x32xbf16, #tpu.memory_space<vmem>>, %arg4: memref<1x32xf32, #tpu.memory_space<vmem>>, %arg5: memref<32x32xbf16, #tpu.memory_space<vmem>>, %arg6: memref<1x32xf32, #tpu.memory_space<vmem>>, %arg7: memref<32x32xbf16, #tpu.memory_space<vmem>>, %arg8: memref<1x32xf32, #tpu.memory_space<vmem>>, %arg9: memref<32x32xbf16, #tpu.memory_space<vmem>>, %arg10: memref<1x32xf32, #tpu.memory_space<vmem>>, %arg11: memref<1x16x32xf32, #tpu.memory_space<vmem>>, %arg12: memref<32x32xbf16, #tpu.memory_space<vmem>>, %arg13: memref<32x32xbf16, #tpu.memory_space<vmem>>) attributes {dimension_semantics = [#tpu.dimension_semantics<parallel>, #tpu.dimension_semantics<arbitrary>], iteration_bounds = array<i64: 2, 2>, scalar_prefetch = 0 : i64, scratch_operands = 2 : i64, tpu.core_type = #tpu.core_type<tc>, window_params = [{transform_indices = @transform_0, window_bounds = array<i64: 1, 32, 32>}, {pipeline_mode = #tpu.pipeline_mode<synchronous>, transform_indices = @transform_1, window_bounds = array<i64: 32, 32>}, {pipeline_mode = #tpu.pipeline_mode<synchronous>, transform_indices = @transform_2, window_bounds = array<i64: 1, 32>}, {pipeline_mode = #tpu.pipeline_mode<synchronous>, transform_indices = @transform_3, window_bounds = array<i64: 32, 32>}, {pipeline_mode = #tpu.pipeline_mode<synchronous>, transform_indices = @transform_4, window_bounds = array<i64: 1, 32>}, {pipeline_mode = #tpu.pipeline_mode<synchronous>, transform_indices = @transform_5, window_bounds = array<i64: 32, 32>}, {pipeline_mode = #tpu.pipeline_mode<synchronous>, transform_indices = @transform_6, window_bounds = array<i64: 1, 32>}, {pipeline_mode = #tpu.pipeline_mode<synchronous>, transform_indices = @transform_7, window_bounds = array<i64: 32, 32>}, {pipeline_mode = #tpu.pipeline_mode<synchronous>, transform_indices = @transform_8, window_bounds = array<i64: 1, 32>}, {transform_indices = @transform_9, window_bounds = array<i64: 1, 16, 32>}]} {
    %c0_i32 = arith.constant 0 : i32
    %0 = arith.cmpi eq, %arg1, %c0_i32 : i32
    %1 = arith.extui %0 : i1 to i32
    %c0_i32_0 = arith.constant 0 : i32
    %2 = arith.cmpi ne, %1, %c0_i32_0 : i32
    scf.if %2 {
      %c0_45 = arith.constant 0 : index
      %c0_46 = arith.constant 0 : index
      %c0_47 = arith.constant 0 : index
      %103 = vector.load %arg2[%c0_45, %c0_46, %c0_47] : memref<1x32x32xbf16, #tpu.memory_space<vmem>>, vector<1x32x32xbf16>
      %104 = vector.shape_cast %103 : vector<1x32x32xbf16> to vector<32x32xbf16>
      %c0_48 = arith.constant 0 : index
      %c0_49 = arith.constant 0 : index
      %105 = vector.load %arg5[%c0_48, %c0_49] : memref<32x32xbf16, #tpu.memory_space<vmem>>, vector<32x32xbf16>
      %cst_50 = arith.constant dense<0.000000e+00> : vector<32x32xf32>
      %106 = tpu.matmul %104, %105, %cst_50 {dimension_numbers = #tpu.dot_dimension_numbers<[1], [0], [0], [1], [0, 0, 1, 1], [], []>} : vector<32x32xbf16>, vector<32x32xbf16>, vector<32x32xf32> -> vector<32x32xf32>
      %c0_51 = arith.constant 0 : index
      %c0_52 = arith.constant 0 : index
      %107 = vector.load %arg6[%c0_51, %c0_52] : memref<1x32xf32, #tpu.memory_space<vmem>>, vector<1x32xf32>
      %108 = vector.broadcast %107 : vector<1x32xf32> to vector<32x32xf32>
      %109 = arith.addf %106, %108 : vector<32x32xf32>
      %110 = arith.truncf %109 : vector<32x32xf32> to vector<32x32xbf16>
      %c0_53 = arith.constant 0 : index
      %c0_54 = arith.constant 0 : index
      %111 = vector.load %arg12[%c0_53, %c0_54] : memref<32x32xbf16, #tpu.memory_space<vmem>>, vector<32x32xbf16>
      tpu.vector_store %arg12[%c0_53, %c0_54], %110 {strides = array<i32>} : memref<32x32xbf16, #tpu.memory_space<vmem>>, vector<32x32xbf16>,
      %c0_55 = arith.constant 0 : index
      %c0_56 = arith.constant 0 : index
      %112 = vector.load %arg7[%c0_55, %c0_56] : memref<32x32xbf16, #tpu.memory_space<vmem>>, vector<32x32xbf16>
      %cst_57 = arith.constant dense<0.000000e+00> : vector<32x32xf32>
      %113 = tpu.matmul %104, %112, %cst_57 {dimension_numbers = #tpu.dot_dimension_numbers<[1], [0], [0], [1], [0, 0, 1, 1], [], []>} : vector<32x32xbf16>, vector<32x32xbf16>, vector<32x32xf32> -> vector<32x32xf32>
      %c0_58 = arith.constant 0 : index
      %c0_59 = arith.constant 0 : index
      %114 = vector.load %arg8[%c0_58, %c0_59] : memref<1x32xf32, #tpu.memory_space<vmem>>, vector<1x32xf32>
      %115 = vector.broadcast %114 : vector<1x32xf32> to vector<32x32xf32>
      %116 = arith.addf %113, %115 : vector<32x32xf32>
      %117 = arith.truncf %116 : vector<32x32xf32> to vector<32x32xbf16>
      %c0_60 = arith.constant 0 : index
      %c0_61 = arith.constant 0 : index
      %118 = vector.load %arg13[%c0_60, %c0_61] : memref<32x32xbf16, #tpu.memory_space<vmem>>, vector<32x32xbf16>
      tpu.vector_store %arg13[%c0_60, %c0_61], %117 {strides = array<i32>} : memref<32x32xbf16, #tpu.memory_space<vmem>>, vector<32x32xbf16>,
    } else {
    }
    %c16_i32 = arith.constant 16 : i32
    %3 = arith.muli %arg1, %c16_i32 : i32
    %4 = tpu.assume_multiple %3, 16 : i32
    %c0 = arith.constant 0 : index
    %5 = arith.index_cast %4 : i32 to index
    %c0_1 = arith.constant 0 : index
    %6 = vector.load %arg2[%c0, %5, %c0_1] : memref<1x32x32xbf16, #tpu.memory_space<vmem>>, vector<1x16x32xbf16>
    %7 = vector.shape_cast %6 : vector<1x16x32xbf16> to vector<16x32xbf16>
    %c0_2 = arith.constant 0 : index
    %c0_3 = arith.constant 0 : index
    %8 = vector.load %arg3[%c0_2, %c0_3] : memref<32x32xbf16, #tpu.memory_space<vmem>>, vector<32x32xbf16>
    %cst = arith.constant dense<0.000000e+00> : vector<16x32xf32>
    %9 = tpu.matmul %7, %8, %cst {dimension_numbers = #tpu.dot_dimension_numbers<[1], [0], [0], [1], [0, 0, 1, 1], [], []>} : vector<16x32xbf16>, vector<32x32xbf16>, vector<16x32xf32> -> vector<16x32xf32>
    %c0_4 = arith.constant 0 : index
    %c0_5 = arith.constant 0 : index
    %10 = vector.load %arg4[%c0_4, %c0_5] : memref<1x32xf32, #tpu.memory_space<vmem>>, vector<1x32xf32>
    %11 = vector.broadcast %10 : vector<1x32xf32> to vector<16x32xf32>
    %12 = arith.addf %9, %11 : vector<16x32xf32>
    %13 = arith.truncf %12 : vector<16x32xf32> to vector<16x32xbf16>
    %14 = tpu.iota {dimensions = array<i32: 0>} : vector<16x32xi32>
    %15 = vector.broadcast %4 : i32 to vector<16x32xi32>
    %16 = arith.addi %15, %14 : vector<16x32xi32>
    %17 = tpu.iota {dimensions = array<i32: 1>} : vector<16x32xi32>
    %18 = arith.cmpi sle, %17, %16 : vector<16x32xi32>
    %cst_6 = arith.constant 0.000000e+00 : f32
    %cst_7 = arith.constant -1.000000e+09 : f32
    %19 = vector.broadcast %cst_6 : f32 to vector<16x32xf32>
    %20 = vector.broadcast %cst_7 : f32 to vector<16x32xf32>
    %21 = arith.select %18, %19, %20 : vector<16x32xi1>, vector<16x32xf32>
    %22 = vector.extract_strided_slice %13 {offsets = [0, 0], sizes = [16, 8], strides = [1, 1]} : vector<16x32xbf16> to vector<16x8xbf16>
    %c0_8 = arith.constant 0 : index
    %c0_9 = arith.constant 0 : index
    %23 = vector.load %arg12[%c0_8, %c0_9] : memref<32x32xbf16, #tpu.memory_space<vmem>>, vector<32x8xbf16>
    %c0_10 = arith.constant 0 : index
    %c0_11 = arith.constant 0 : index
    %24 = vector.load %arg13[%c0_10, %c0_11] : memref<32x32xbf16, #tpu.memory_space<vmem>>, vector<32x8xbf16>
    "tpu.trace_start"() <{level = 10 : i32, message = "qd,kd->qk"}> : () -> ()
    %cst_12 = arith.constant dense<0.000000e+00> : vector<16x32xf32>
    %25 = tpu.matmul %22, %23, %cst_12 {dimension_numbers = #tpu.dot_dimension_numbers<[1], [1], [0], [0], [0, 0, 1, 0], [], []>} : vector<16x8xbf16>, vector<32x8xbf16>, vector<16x32xf32> -> vector<16x32xf32>
    "tpu.trace_stop"() : () -> ()
    %26 = arith.addf %25, %21 : vector<16x32xf32>
    %cst_13 = arith.constant dense<0xFF800000> : vector<16xf32>
    %27 = vector.multi_reduction <maximumf>, %26, %cst_13 [1] : vector<16x32xf32> to vector<16xf32>
    %28 = vector.shape_cast %27 : vector<16xf32> to vector<16x1xf32>
    %29 = vector.broadcast %28 : vector<16x1xf32> to vector<16x32xf32>
    %30 = arith.subf %26, %29 : vector<16x32xf32>
    %31 = math.exp %30 : vector<16x32xf32>
    %cst_14 = arith.constant dense<0.000000e+00> : vector<16xf32>
    %32 = vector.multi_reduction <add>, %31, %cst_14 [1] : vector<16x32xf32> to vector<16xf32>
    %33 = vector.shape_cast %32 : vector<16xf32> to vector<16x1xf32>
    %34 = arith.truncf %31 : vector<16x32xf32> to vector<16x32xbf16>
    %cst_15 = arith.constant dense<0.000000e+00> : vector<16x8xf32>
    %35 = tpu.matmul %34, %24, %cst_15 {dimension_numbers = #tpu.dot_dimension_numbers<[1], [0], [0], [1], [0, 0, 1, 1], [], []>} : vector<16x32xbf16>, vector<32x8xbf16>, vector<16x8xf32> -> vector<16x8xf32>
    %36 = tpu.reciprocal %33 {approx = true} : vector<16x1xf32> -> vector<16x1xf32>
    %37 = vector.broadcast %36 : vector<16x1xf32> to vector<16x8xf32>
    %38 = arith.mulf %35, %37 : vector<16x8xf32>
    %39 = arith.truncf %38 : vector<16x8xf32> to vector<16x8xbf16>
    %40 = vector.extract_strided_slice %13 {offsets = [0, 8], sizes = [16, 8], strides = [1, 1]} : vector<16x32xbf16> to vector<16x8xbf16>
    %c0_16 = arith.constant 0 : index
    %c8 = arith.constant 8 : index
    %41 = vector.load %arg12[%c0_16, %c8] : memref<32x32xbf16, #tpu.memory_space<vmem>>, vector<32x8xbf16>
    %c0_17 = arith.constant 0 : index
    %c8_18 = arith.constant 8 : index
    %42 = vector.load %arg13[%c0_17, %c8_18] : memref<32x32xbf16, #tpu.memory_space<vmem>>, vector<32x8xbf16>
    "tpu.trace_start"() <{level = 10 : i32, message = "qd,kd->qk"}> : () -> ()
    %cst_19 = arith.constant dense<0.000000e+00> : vector<16x32xf32>
    %43 = tpu.matmul %40, %41, %cst_19 {dimension_numbers = #tpu.dot_dimension_numbers<[1], [1], [0], [0], [0, 0, 1, 0], [], []>} : vector<16x8xbf16>, vector<32x8xbf16>, vector<16x32xf32> -> vector<16x32xf32>
    "tpu.trace_stop"() : () -> ()
    %44 = arith.addf %43, %21 : vector<16x32xf32>
    %cst_20 = arith.constant dense<0xFF800000> : vector<16xf32>
    %45 = vector.multi_reduction <maximumf>, %44, %cst_20 [1] : vector<16x32xf32> to vector<16xf32>
    %46 = vector.shape_cast %45 : vector<16xf32> to vector<16x1xf32>
    %47 = vector.broadcast %46 : vector<16x1xf32> to vector<16x32xf32>
    %48 = arith.subf %44, %47 : vector<16x32xf32>
    %49 = math.exp %48 : vector<16x32xf32>
    %cst_21 = arith.constant dense<0.000000e+00> : vector<16xf32>
    %50 = vector.multi_reduction <add>, %49, %cst_21 [1] : vector<16x32xf32> to vector<16xf32>
    %51 = vector.shape_cast %50 : vector<16xf32> to vector<16x1xf32>
    %52 = arith.truncf %49 : vector<16x32xf32> to vector<16x32xbf16>
    %cst_22 = arith.constant dense<0.000000e+00> : vector<16x8xf32>
    %53 = tpu.matmul %52, %42, %cst_22 {dimension_numbers = #tpu.dot_dimension_numbers<[1], [0], [0], [1], [0, 0, 1, 1], [], []>} : vector<16x32xbf16>, vector<32x8xbf16>, vector<16x8xf32> -> vector<16x8xf32>
    %54 = tpu.reciprocal %51 {approx = true} : vector<16x1xf32> -> vector<16x1xf32>
    %55 = vector.broadcast %54 : vector<16x1xf32> to vector<16x8xf32>
    %56 = arith.mulf %53, %55 : vector<16x8xf32>
    %57 = arith.truncf %56 : vector<16x8xf32> to vector<16x8xbf16>
    %58 = vector.extract_strided_slice %13 {offsets = [0, 16], sizes = [16, 8], strides = [1, 1]} : vector<16x32xbf16> to vector<16x8xbf16>
    %c0_23 = arith.constant 0 : index
    %c16 = arith.constant 16 : index
    %59 = vector.load %arg12[%c0_23, %c16] : memref<32x32xbf16, #tpu.memory_space<vmem>>, vector<32x8xbf16>
    %c0_24 = arith.constant 0 : index
    %c16_25 = arith.constant 16 : index
    %60 = vector.load %arg13[%c0_24, %c16_25] : memref<32x32xbf16, #tpu.memory_space<vmem>>, vector<32x8xbf16>
    "tpu.trace_start"() <{level = 10 : i32, message = "qd,kd->qk"}> : () -> ()
    %cst_26 = arith.constant dense<0.000000e+00> : vector<16x32xf32>
    %61 = tpu.matmul %58, %59, %cst_26 {dimension_numbers = #tpu.dot_dimension_numbers<[1], [1], [0], [0], [0, 0, 1, 0], [], []>} : vector<16x8xbf16>, vector<32x8xbf16>, vector<16x32xf32> -> vector<16x32xf32>
    "tpu.trace_stop"() : () -> ()
    %62 = arith.addf %61, %21 : vector<16x32xf32>
    %cst_27 = arith.constant dense<0xFF800000> : vector<16xf32>
    %63 = vector.multi_reduction <maximumf>, %62, %cst_27 [1] : vector<16x32xf32> to vector<16xf32>
    %64 = vector.shape_cast %63 : vector<16xf32> to vector<16x1xf32>
    %65 = vector.broadcast %64 : vector<16x1xf32> to vector<16x32xf32>
    %66 = arith.subf %62, %65 : vector<16x32xf32>
    %67 = math.exp %66 : vector<16x32xf32>
    %cst_28 = arith.constant dense<0.000000e+00> : vector<16xf32>
    %68 = vector.multi_reduction <add>, %67, %cst_28 [1] : vector<16x32xf32> to vector<16xf32>
    %69 = vector.shape_cast %68 : vector<16xf32> to vector<16x1xf32>
    %70 = arith.truncf %67 : vector<16x32xf32> to vector<16x32xbf16>
    %cst_29 = arith.constant dense<0.000000e+00> : vector<16x8xf32>
    %71 = tpu.matmul %70, %60, %cst_29 {dimension_numbers = #tpu.dot_dimension_numbers<[1], [0], [0], [1], [0, 0, 1, 1], [], []>} : vector<16x32xbf16>, vector<32x8xbf16>, vector<16x8xf32> -> vector<16x8xf32>
    %72 = tpu.reciprocal %69 {approx = true} : vector<16x1xf32> -> vector<16x1xf32>
    %73 = vector.broadcast %72 : vector<16x1xf32> to vector<16x8xf32>
    %74 = arith.mulf %71, %73 : vector<16x8xf32>
    %75 = arith.truncf %74 : vector<16x8xf32> to vector<16x8xbf16>
    %76 = vector.extract_strided_slice %13 {offsets = [0, 24], sizes = [16, 8], strides = [1, 1]} : vector<16x32xbf16> to vector<16x8xbf16>
    %c0_30 = arith.constant 0 : index
    %c24 = arith.constant 24 : index
    %77 = vector.load %arg12[%c0_30, %c24] : memref<32x32xbf16, #tpu.memory_space<vmem>>, vector<32x8xbf16>
    %c0_31 = arith.constant 0 : index
    %c24_32 = arith.constant 24 : index
    %78 = vector.load %arg13[%c0_31, %c24_32] : memref<32x32xbf16, #tpu.memory_space<vmem>>, vector<32x8xbf16>
    "tpu.trace_start"() <{level = 10 : i32, message = "qd,kd->qk"}> : () -> ()
    %cst_33 = arith.constant dense<0.000000e+00> : vector<16x32xf32>
    %79 = tpu.matmul %76, %77, %cst_33 {dimension_numbers = #tpu.dot_dimension_numbers<[1], [1], [0], [0], [0, 0, 1, 0], [], []>} : vector<16x8xbf16>, vector<32x8xbf16>, vector<16x32xf32> -> vector<16x32xf32>
    "tpu.trace_stop"() : () -> ()
    %80 = arith.addf %79, %21 : vector<16x32xf32>
    %cst_34 = arith.constant dense<0xFF800000> : vector<16xf32>
    %81 = vector.multi_reduction <maximumf>, %80, %cst_34 [1] : vector<16x32xf32> to vector<16xf32>
    %82 = vector.shape_cast %81 : vector<16xf32> to vector<16x1xf32>
    %83 = vector.broadcast %82 : vector<16x1xf32> to vector<16x32xf32>
    %84 = arith.subf %80, %83 : vector<16x32xf32>
    %85 = math.exp %84 : vector<16x32xf32>
    %cst_35 = arith.constant dense<0.000000e+00> : vector<16xf32>
    %86 = vector.multi_reduction <add>, %85, %cst_35 [1] : vector<16x32xf32> to vector<16xf32>
    %87 = vector.shape_cast %86 : vector<16xf32> to vector<16x1xf32>
    %88 = arith.truncf %85 : vector<16x32xf32> to vector<16x32xbf16>
    %cst_36 = arith.constant dense<0.000000e+00> : vector<16x8xf32>
    %89 = tpu.matmul %88, %78, %cst_36 {dimension_numbers = #tpu.dot_dimension_numbers<[1], [0], [0], [1], [0, 0, 1, 1], [], []>} : vector<16x32xbf16>, vector<32x8xbf16>, vector<16x8xf32> -> vector<16x8xf32>
    %90 = tpu.reciprocal %87 {approx = true} : vector<16x1xf32> -> vector<16x1xf32>
    %91 = vector.broadcast %90 : vector<16x1xf32> to vector<16x8xf32>
    %92 = arith.mulf %89, %91 : vector<16x8xf32>
    %93 = arith.truncf %92 : vector<16x8xf32> to vector<16x8xbf16>
    %94 = tpu.concatenate %39, %57, %75, %93 in 1 : vector<16x8xbf16>, vector<16x8xbf16>, vector<16x8xbf16>, vector<16x8xbf16> -> vector<16x32xbf16>
    %c0_37 = arith.constant 0 : index
    %c0_38 = arith.constant 0 : index
    %95 = vector.load %arg9[%c0_37, %c0_38] : memref<32x32xbf16, #tpu.memory_space<vmem>>, vector<32x32xbf16>
    %cst_39 = arith.constant dense<0.000000e+00> : vector<16x32xf32>
    %96 = tpu.matmul %94, %95, %cst_39 {dimension_numbers = #tpu.dot_dimension_numbers<[1], [0], [0], [1], [0, 0, 1, 1], [], []>} : vector<16x32xbf16>, vector<32x32xbf16>, vector<16x32xf32> -> vector<16x32xf32>
    %c0_40 = arith.constant 0 : index
    %c0_41 = arith.constant 0 : index
    %97 = vector.load %arg10[%c0_40, %c0_41] : memref<1x32xf32, #tpu.memory_space<vmem>>, vector<1x32xf32>
    %98 = vector.broadcast %97 : vector<1x32xf32> to vector<16x32xf32>
    %99 = arith.addf %96, %98 : vector<16x32xf32>
    %c0_42 = arith.constant 0 : index
    %c0_43 = arith.constant 0 : index
    %c0_44 = arith.constant 0 : index
    %100 = vector.load %arg11[%c0_42, %c0_43, %c0_44] : memref<1x16x32xf32, #tpu.memory_space<vmem>>, vector<1x16x32xf32>
    %101 = vector.shape_cast %100 : vector<1x16x32xf32> to vector<16x32xf32>
    %102 = vector.shape_cast %99 : vector<16x32xf32> to vector<1x16x32xf32>
    tpu.vector_store %arg11[%c0_42, %c0_43, %c0_44], %102 {strides = array<i32>} : memref<1x16x32xf32, #tpu.memory_space<vmem>>, vector<1x16x32xf32>,
    return
  }
  func.func @transform_0(%arg0: i32, %arg1: i32) -> (i32, i32, i32) {
    %c0_i32 = arith.constant 0 : i32
    %c0_i32_0 = arith.constant 0 : i32
    %c0_i32_1 = arith.constant 0 : i32
    return %arg0, %c0_i32, %c0_i32_0 : i32, i32, i32
  }
  func.func @transform_1(%arg0: i32, %arg1: i32) -> (i32, i32) {
    %c0_i32 = arith.constant 0 : i32
    %c0_i32_0 = arith.constant 0 : i32
    %c0_i32_1 = arith.constant 0 : i32
    return %c0_i32, %c0_i32_0 : i32, i32
  }
  func.func @transform_2(%arg0: i32, %arg1: i32) -> (i32, i32) {
    %c0_i32 = arith.constant 0 : i32
    %c0_i32_0 = arith.constant 0 : i32
    %c0_i32_1 = arith.constant 0 : i32
    return %c0_i32, %c0_i32_0 : i32, i32
  }
  func.func @transform_3(%arg0: i32, %arg1: i32) -> (i32, i32) {
    %c0_i32 = arith.constant 0 : i32
    %c0_i32_0 = arith.constant 0 : i32
    %c0_i32_1 = arith.constant 0 : i32
    return %c0_i32, %c0_i32_0 : i32, i32
  }
  func.func @transform_4(%arg0: i32, %arg1: i32) -> (i32, i32) {
    %c0_i32 = arith.constant 0 : i32
    %c0_i32_0 = arith.constant 0 : i32
    %c0_i32_1 = arith.constant 0 : i32
    return %c0_i32, %c0_i32_0 : i32, i32
  }
  func.func @transform_5(%arg0: i32, %arg1: i32) -> (i32, i32) {
    %c0_i32 = arith.constant 0 : i32
    %c0_i32_0 = arith.constant 0 : i32
    %c0_i32_1 = arith.constant 0 : i32
    return %c0_i32, %c0_i32_0 : i32, i32
  }
  func.func @transform_6(%arg0: i32, %arg1: i32) -> (i32, i32) {
    %c0_i32 = arith.constant 0 : i32
    %c0_i32_0 = arith.constant 0 : i32
    %c0_i32_1 = arith.constant 0 : i32
    return %c0_i32, %c0_i32_0 : i32, i32
  }
  func.func @transform_7(%arg0: i32, %arg1: i32) -> (i32, i32) {
    %c0_i32 = arith.constant 0 : i32
    %c0_i32_0 = arith.constant 0 : i32
    %c0_i32_1 = arith.constant 0 : i32
    return %c0_i32, %c0_i32_0 : i32, i32
  }
  func.func @transform_8(%arg0: i32, %arg1: i32) -> (i32, i32) {
    %c0_i32 = arith.constant 0 : i32
    %c0_i32_0 = arith.constant 0 : i32
    %c0_i32_1 = arith.constant 0 : i32
    return %c0_i32, %c0_i32_0 : i32, i32
  }
  func.func @transform_9(%arg0: i32, %arg1: i32) -> (i32, i32, i32) {
    %c0_i32 = arith.constant 0 : i32
    %c0_i32_0 = arith.constant 0 : i32
    return %arg0, %arg1, %c0_i32 : i32, i32, i32
  }
}

</mosaic_0001>

<bundles_post_ra>
// kernel: tpu_custom_call.1
= control target key start
LH: loop header
LB: loop body
LE: loop exit
PB: predicated region body
PF: predicated region fallthrough
CT: control target
= control target key end

     0   :  { %s2686_s0 = inlined_call_operand.hbm [shape: bf16[2,32,32], index: 0, kind: input, shape index: {}]   ;;  %s2687_s1 = inlined_call_operand.hbm [shape: bf16[32,32], index: 1, kind: input, shape index: {}]   ;;  %s2688_s2 = inlined_call_operand.vmem [shape: f32[1,32], index: 2, kind: input, shape index: {}]   ;;  %s2689_s3 = inlined_call_operand.hbm [shape: bf16[32,32], index: 3, kind: input, shape index: {}]   ;;  %s2690_s4 = inlined_call_operand.vmem [shape: f32[1,32], index: 4, kind: input, shape index: {}]   ;;  %s2691_s5 = inlined_call_operand.vmem [shape: bf16[32,32], index: 5, kind: input, shape index: {}]   ;;  %s2692_s6 = inlined_call_operand.vmem [shape: f32[1,32], index: 6, kind: input, shape index: {}]   ;;  %s2693_s7 = inlined_call_operand.hbm [shape: bf16[32,32], index: 7, kind: input, shape index: {}]   ;;  %s2694_s8 = inlined_call_operand.vmem [shape: f32[1,32], index: 8, kind: input, shape index: {}]   ;;  %s2695_s9 = inlined_call_operand.hbm [shape: f32[2,32,32], index: 9, kind: output, shape index: {}]  }
   0x1   :  { %2710 = sst [smem:[#allocation21_spill]] %s2687_s1 }
   0x2   :  { %2711 = sst [smem:[#allocation22_spill]] %s2688_s2 }
   0x3   :  { %2712 = sst [smem:[#allocation23_spill]] %s2689_s3 }
   0x4   :  { %2713 = sst [smem:[#allocation24_spill]] %s2690_s4 }
   0x5   :  { %2714 = sst [smem:[#allocation25_spill]] %s2691_s5 }
   0x6   :  { %2715 = sst [smem:[#allocation26_spill]] %s2692_s6 }
   0x7   :  { %2716 = sst [smem:[#allocation27_spill]] %s2694_s8 }
   0x8   :  { %2717 = sst [smem:[#allocation28_spill]] %s2695_s9 }
   0x9   :  { %14 = vsyncpa [#allocation5], 0 }
   0xa   :  { %16 = vsyncpa [#allocation5 + $0x1], 0 }
   0xb   :  { %17 = vsyncpa [#allocation8], 0 }
   0xc   :  { %18 = vsyncpa [#allocation11], 0 }
   0xd   :  { %19 = vsyncpa [#allocation6], 0 }
   0xe   :  { %21 = vsyncpa [#allocation6 + $0x1], 0  ;;  %s2129_s30 = smov 0   ;;  %s2131_s10 = smov 0  }
   0xf   :  { %s2133_s11 = smov 0   ;;  %s2135_s12 = smov 0  }
  0x10   :  { %s2137_s13 = smov 0   ;;  %s2139_s14 = smov 0  }
  0x11   :  { %s2141_s15 = smov 0   ;;  %s2143_s16 = smov 0  }
  0x12   :  { %s2145_s17 = smov 0   ;;  %s2147_s18 = smov 0  }
  0x13   :  { %s2149_s19 = smov 0  }
  0x14 LB: > { %2718 = sst [smem:[#allocation17_spill]] %s2020_s30  ;;  %s1439_s20 = sadd.s32 4294967295, %s2060_s19   ;;  %s2060_s19 = sphi %s2149_s19, %s27_s19   ;;  %s2056_s18 = sphi %s2147_s18, %s2763_s18   ;;  %s2052_s17 = sphi %s2145_s17, %s2762_s17   ;;  %s2048_s16 = sphi %s2143_s16, %s2761_s16   ;;  %s2044_s15 = sphi %s2141_s15, %s2760_s15   ;;  %s2040_s14 = sphi %s2139_s14, %s2759_s14   ;;  %s2036_s13 = sphi %s2137_s13, %s2758_s13   ;;  %s2032_s12 = sphi %s2135_s12, %s2757_s12   ;;  %s2028_s11 = sphi %s2133_s11, %s2756_s11   ;;  %s2024_s10 = sphi %s2131_s10, %s2755_s10   ;;  %s2020_s30 = sphi %s2129_s30, %s2754_s30  }
  0x15   : > { %2719 = sst [smem:[#allocation18_spill]] %s2048_s16  ;;  %s1440_s21 = sadd.s32 4294967294, %s2060_s19  }
  0x16   : > { %p59_p0 = scmp.ne.s32.totalorder %s2036_s13, %s2032_s12  ;;  %p2185_p1 = scmp.eq.s32.totalorder %s1439_s20, 0 }
  0x17   : > { %p252_p2 = scmp.ne.s32.totalorder %s2028_s11, %s2024_s10  ;;  %p253_p4 = scmp.eq.s32.totalorder %s1439_s20, 3 }
  0x18   : > { %s2720_s22 = scalar_select %p2185_p1, 1, 0 }
  0x19   : > { %p2194_p3 = por %p2185_p1, %p59_p0  ;;  %p258_p5 = scmp.ne.s32.totalorder %s2024_s10, %s2020_s30 }
  0x1a   : > { %p259_p6 = scmp.eq.s32.totalorder %s1440_s21, 3  ;;  %p2200_p7 = por %p253_p4, %p252_p2 }
  0x1b   : > { %s2721_s24 = scalar_select %p2194_p3, 1, 0 }
  0x1c   : > { %s2722_s25 = scalar_select %p2200_p7, 1, 0 }
  0x1d   : > { %p1441_p8 = scmp.ge.s32.totalorder %s2060_s19, 1  ;;  %p2205_p9 = por %p259_p6, %p258_p5 }
  0x1e   : > { %2723 = sst [smem:[#allocation19_spill]] %s2722_s25  ;;  %p266_p10 = scmp.lt.s32.totalorder %s2060_s19, 5 }
  0x1f   : > { %s2724_s26 = scalar_select %p2205_p9, 1, 0 }
  0x20   : > { %p2210_p11 = pnand %p1441_p8, %p266_p10  ;;  %s2062_s28 = smov [#allocation7]  }
  0x21   : > { %2725 = sst [smem:[#allocation20_spill]] %s2724_s26  ;;  %s278_s29 = sshll.u32 %s2062_s28, 4  ;;  %s2214_s29 = int_to_ptr.vmem [resolvable:$true] %s278_s29 }
  0x22   : > { %s2726_s27 = scalar_select %p2210_p11, 1, 0 }
  0x23   : > { %p1644_p12 = pneg %p2210_p11  ;;  %s2063_s20 = smov [#allocation9]  }
  0x24   : > { %s294_s21 = sshll.u32 %s2063_s20, 4  ;;  %s2064_s23 = smov [#allocation10]   ;;  %s2224_s21 = int_to_ptr.vmem [resolvable:$true] %s294_s21 }
  0x25   : > { %p2220_p13 = pnand %p1644_p12, %p2185_p1  ;;  %s2226_s26 = sshll.u32 %s2064_s23, 4  ;;  %s317_s26 = int_to_ptr.vmem [resolvable:$true] %s2226_s26 }
  0x26   : > { %s2728_s1 = sld [smem:[#allocation21_spill]] }
  0x27   : > { %p2236_p2 = pneg %p2220_p13 }
  0x2c   : > { %s1816_s28 = scalar_lea.hbm %s2728_s1, 256 }
  0x2d   : > { %p1817_p0 = scmp.ne.s32.totalorder %s2728_s1, %s1816_s28  ;;  %p1823_p6 = scmp.lt.u32.totalorder %s1816_s28, %s2728_s1 }
  0x2f   : > { %p1819_p4 = pnand %p2236_p2, %p1817_p0 }
  0x31   : > { %p1820_p5 = pneg %p1819_p4 }
  0x33   : > { %p1825_p8 = pnand %p1823_p6, %p1820_p5 }
  0x35   : > { %1828 = shalt.err (!%p1825_p8)
}
  0x36   : > { %s1829_s8 = scalar_lea.vmem %s2214_s29, 256  ;;  %p1837_p7 = scmp.lt.s32.totalorder %s2214_s29, %s2214_s29 }
  0x37   : > { %p1830_p10 = scmp.ne.s32.totalorder %s2214_s29, %s1829_s8  ;;  %p1838_p1 = scmp.lt.s32.totalorder %s1829_s8, %s1829_s8 }
  0x39   : > { %p1832_p12 = pnand %p1830_p10, %p2236_p2  ;;  %p1839_p0 = por %p1838_p1, %p1837_p7 }
  0x3b   : > { %p1833_p9 = pneg %p1832_p12 }
  0x3d   : > { %p1840_p4 = pnand %p1839_p0, %p1833_p9 }
  0x3f   : > { %1843 = shalt.err (!%p1840_p4)
}
  0x40   : > { %s2707_s9 = smov 64   ;;  %s2708_s30 = smov 4  }
  0x41   : > { %1647 = dma.hbm_to_vmem [thread:$0]  (!%p2220_p13), %s2728_s1, 256, %s2214_s29, [#allocation8], %s2707_s9, %s2707_s9, %s2708_s30  }
  0x42   : > { %s2730_s3 = sld [smem:[#allocation23_spill]] }
  0x48   : > { %s1844_s8 = scalar_lea.hbm %s2730_s3, 256 }
  0x49   : > { %p1845_p1 = scmp.ne.s32.totalorder %s2730_s3, %s1844_s8  ;;  %p1851_p5 = scmp.lt.u32.totalorder %s1844_s8, %s2730_s3 }
  0x4b   : > { %p1847_p7 = pnand %p1845_p1, %p2236_p2 }
  0x4d   : > { %p1848_p9 = pneg %p1847_p7 }
  0x4f   : > { %p1853_p6 = pnand %p1851_p5, %p1848_p9 }
  0x51   : > { %1856 = shalt.err (!%p1853_p6)
}
  0x52   : > { %s1857_s29 = scalar_lea.vmem %s2224_s21, 256  ;;  %p1865_p0 = scmp.lt.s32.totalorder %s2224_s21, %s2224_s21 }
  0x53   : > { %p1858_p8 = scmp.ne.s32.totalorder %s2224_s21, %s1857_s29  ;;  %p1866_p4 = scmp.lt.s32.totalorder %s1857_s29, %s1857_s29 }
  0x55   : > { %p1860_p10 = pnand %p1858_p8, %p2236_p2  ;;  %p1867_p1 = por %p1866_p4, %p1865_p0 }
  0x57   : > { %p1861_p12 = pneg %p1860_p10 }
  0x59   : > { %p1868_p7 = pnand %p1867_p1, %p1861_p12 }
  0x5b   : > { %1871 = shalt.err (!%p1868_p7)
}
  0x5c   : > { %1650 = dma.hbm_to_vmem [thread:$0]  (!%p2220_p13), %s2730_s3, 256, %s2224_s21, [#allocation8], %s2707_s9, %s2707_s9, %s2708_s30  }
  0x5d   : > { %s1872_s25 = scalar_lea.hbm %s2693_s7, 256 }
  0x5e   : > { %p1873_p9 = scmp.ne.s32.totalorder %s2693_s7, %s1872_s25  ;;  %p1879_p8 = scmp.lt.u32.totalorder %s1872_s25, %s2693_s7 }
  0x60   : > { %p1875_p5 = pnand %p1873_p9, %p2236_p2 }
  0x62   : > { %p1876_p6 = pneg %p1875_p5 }
  0x64   : > { %p1881_p10 = pnand %p1879_p8, %p1876_p6 }
  0x66   : > { %1884 = shalt.err (!%p1881_p10)
}
  0x67   : > { %s1885_s29 = scalar_lea.vmem %s317_s26, 256  ;;  %p1893_p1 = scmp.lt.s32.totalorder %s317_s26, %s317_s26 }
  0x68   : > { %p1886_p12 = scmp.ne.s32.totalorder %s317_s26, %s1885_s29  ;;  %p1894_p7 = scmp.lt.s32.totalorder %s1885_s29, %s1885_s29 }
  0x6a   : > { %p1888_p0 = pnand %p1886_p12, %p2236_p2  ;;  %p1895_p3 = por %p1894_p7, %p1893_p1 }
  0x6c   : > { %p1889_p4 = pneg %p1888_p0 }
  0x6e   : > { %p1896_p11 = pnand %p1895_p3, %p1889_p4 }
  0x70   : > { %1899 = shalt.err (!%p1896_p11)
}
  0x71   : > { %1653 = dma.hbm_to_vmem [thread:$0]  (!%p2220_p13), %s2693_s7, 256, %s317_s26, [#allocation11], %s2707_s9, %s2707_s9, %s2708_s30  }
  0x72   : > { %s36_s16 = sadd.s32 1, %s2052_s17  ;;  %s39_s12 = sadd.s32 1, %s2056_s18 }
  0x73   : > { %p37_p3 = scmp.ge.s32.totalorder %s36_s16, 2  ;;  %s46_s4 = sadd.s32 1, %s2040_s14 }
  0x74   : > { %p53_p11 = scmp.ne.s32.totalorder %s2040_s14, %s2036_s13  ;;  %p54_p2 = scmp.eq.s32.totalorder %s2060_s19, 0 }
  0x75   : > { %s2765_s16 = smov (%p37_p3, %s36_s16), 0  ;;  %s2767_s12 = smov (!%p37_p3, %s39_s12), %s2056_s18 }
  0x76   : > { %s238_s5 = ssub.s32 %s2052_s17, %s2765_s16  ;;  %p41_p9 = scmp.ge.s32.totalorder %s2767_s12, 2 }
  0x77   : > { %p1665_p5 = scmp.lt.s32.totalorder %s2060_s19, 4  ;;  %p2320_p13 = por %p54_p2, %p53_p11 }
  0x78   : > { %s333_s6 = sand.u32 1, %s2040_s14   ;;  %s2769_s12 = smov (%p41_p9, %s2767_s12), 0 }
  0x79   : > { %s1446_s25 = sshll.u32 %s333_s6, 4  ;;  %s43_s28 = ssub.s32 %s2056_s18, %s2769_s12 }
  0x7a   : > { %p44_p6 = scmp.eq.s32.totalorder %s43_s28, 0  ;;  %s239_s20 = sor.u32 %s238_s5, %s43_s28 }
  0x7b   : > { %p240_p8 = scmp.eq.s32.totalorder %s239_s20, 0  ;;  %s1493_s23 = sshll.u32 %s2056_s18, 8 }
  0x7c   : > { %s2331_s8 = scalar_select %p44_p6, %s2040_s14, %s46_s4  }
  0x7d   : > { %s2732_s29 = sadd.s32 1, %s2028_s11  ;;  %s2341_s30 = scalar_lea.hbm %s2686_s0, %s1493_s23 }
  0x7e   : > { %s2336_s21 = scalar_select %p240_p8, %s2028_s11, %s2732_s29  }
  0x7f   : > { %s337_s1 = scalar_lea.vmem [#allocation4], %s1446_s25  ;;  %p2349_p10 = pnand %p1665_p5, %p2320_p13 }
  0x80   : > { %s344_s3 = sshll.u32 %s337_s1, 4  ;;  %s2353_s5 = scalar_lea.sflag [#allocation5], %s333_s6  ;;  %s2343_s3 = int_to_ptr.vmem [resolvable:$true] %s344_s3 }
  0x81   : > { %s1900_s9 = scalar_lea.hbm %s2341_s30, 256  ;;  %p1902_p0 = pneg %p2349_p10 }
  0x82   : > { %p1901_p12 = scmp.ne.s32.totalorder %s2341_s30, %s1900_s9  ;;  %s1905_s26 = scalar_lea.hbm %s2686_s0, 512 }
  0x83   : > { %p1906_p7 = scmp.lt.u32.totalorder %s2341_s30, %s2686_s0  ;;  %p1907_p3 = scmp.lt.u32.totalorder %s1905_s26, %s1900_s9 }
  0x84   : > { %p1903_p4 = pnand %p1902_p0, %p1901_p12  ;;  %p1909_p2 = scmp.lt.u32.totalorder %s1900_s9, %s2341_s30 }
  0x85   : > { %p1908_p11 = por %p1907_p3, %p1906_p7 }
  0x86   : > { %p1904_p1 = pneg %p1903_p4 }
  0x87   : > { %p1910_p9 = por %p1909_p2, %p1908_p11 }
  0x89   : > { %p1911_p5 = pnand %p1910_p9, %p1904_p1 }
  0x8b   : > { %1914 = shalt.err (!%p1911_p5)
}
  0x8c   : > { %s1915_s6 = scalar_lea.vmem %s2343_s3, 256  ;;  %s2067_s23 = smov [#allocation4]  }
  0x8d   : > { %p1916_p13 = scmp.ne.s32.totalorder %s2343_s3, %s1915_s6  ;;  %s1920_s29 = sshll.u32 %s2067_s23, 4  ;;  %s1921_s29 = int_to_ptr.vmem [resolvable:$false] %s1920_s29 }
  0x8e   : > { %s1922_s2 = scalar_lea.vmem %s1921_s29, 512  ;;  %p1923_p12 = scmp.lt.s32.totalorder %s2343_s3, %s1921_s29 }
  0x8f   : > { %p1918_p6 = pnand %p1916_p13, %p1902_p0  ;;  %p1924_p4 = scmp.lt.s32.totalorder %s1922_s2, %s1915_s6 }
  0x91   : > { %p1919_p8 = pneg %p1918_p6  ;;  %p1925_p7 = por %p1924_p4, %p1923_p12 }
  0x93   : > { %p1926_p3 = pnand %p1925_p7, %p1919_p8 }
  0x95   : > { %1929 = shalt.err (!%p1926_p3)
}
  0x96   : > { %s2734_s9 = smov 4   ;;  %s2735_s1 = smov 64  }
  0x97   : > { %1657 = dma.hbm_to_vmem [thread:$0]  (!%p2349_p10), %s2341_s30, 256, %s2343_s3, %s2353_s5, %s2735_s1, %s2735_s1, %s2734_s9  }
  0x98   : > { %p2736_p0 = scmp.ne.s32.totalorder %s2726_s27, 0 }
  0x99   : > { %s358_s25 = sand.u32 (!%p2736_p0), 1, %s2036_s13   ;;  %p2737_p1 = scmp.ne.s32.totalorder (!%p2736_p0), %s2721_s24, 0 }
  0x9a   : > { %356 = sbr.rel (%p2736_p0) target bundleno = 2749 (0xabd), region = 56  ;;  %s1450_s26 = sshll.u32 (!%p2736_p0), %s358_s25, 4 }
  0x9b   : > { %s359_s28 = scalar_lea.sflag (!%p2736_p0), [#allocation5], %s358_s25  ;;  %s2387_s20 = scalar_lea.vmem (!%p2736_p0), [#allocation4], %s1450_s26 }
  0xa1   : > { %2003 = dma.done.wait (%p2737_p1), %s359_s28, 256  }
  0xa2   : > { %2005 = vsyncadd (%p2737_p1), %s359_s28, 4294967040  ;;  %p2738_p11 = scmp.ne.s32.totalorder %s2720_s22, 0 }
  0xa4   : > { %2007 = dma.done.wait (%p2738_p11), [#allocation8], 512  }
  0xa5   : > { %2009 = vsyncadd (%p2738_p11), [#allocation8], 4294966784 }
  0xa6   : > { %2011 = dma.done.wait (%p2738_p11), [#allocation11], 256  }
  0xa7   : > { %2013 = vsyncadd (%p2738_p11), [#allocation11], 4294967040  ;;  %s406_s3 = sand.u32 1, %s2024_s10   ;;  %p1455_p10 = scmp.ne.s32.totalorder %s2044_s15, 0 }
  0xa8   : > { %s1454_s27 = sshll.u32 %s406_s3, 4  ;;  %v1773_v0 = vld [vmem:[#allocation9] sm:$0xff] (!%p1455_p10)   ;;  %s2739_s5 = sld [smem:[#allocation25_spill]] (!%p1455_p10)  ;;  %v1775_v2 = vld [vmem:[#allocation9 + $0x8] sm:$0xff] (!%p1455_p10)   ;;  %vm452_vm0 = vcmask (!%p1455_p10), 261120  }
  0xa9   : > { %s2404_s30 = scalar_lea.vmem [#allocation12], %s1454_s27  ;;  %414 = sbr.rel (%p1455_p10) target bundleno = 403 (0x193), region = 76  ;;  %1532 = vmatprep.subr.bf16.mxu0 (!%p1455_p10), %v1773_v0  ;;  %v1777_v4 = vld [vmem:[%s2387_s20] sm:$0xff] (!%p1455_p10)   ;;  %v1778_v5 = vld [vmem:[%s2387_s20 + $0x8] sm:$0xff] (!%p1455_p10)  }
  0xaa   : > { %1533 = vmatpush3.bf16.msra.mxu0 (!%p1455_p10), %v1773_v0  ;;  %1536 = vmatprep.mubr.msk.bf16.mxu0 (!%p1455_p10), %vm452_vm0, %v1777_v4  ;;  %s2740_s2 = sld [smem:[#allocation24_spill]] (!%p1455_p10)  ;;  %s2741_s25 = sld [smem:[#allocation26_spill]] (!%p1455_p10) }
  0xab   : > { %1534 = vmatprep.subr.bf16.mxu0 (!%p1455_p10), %v1775_v2  ;;  %1544 = vmatprep.mubr.msk.bf16.mxu1 (!%p1455_p10), %vm452_vm0, %v1777_v4 }
  0xae   : > { %v1774_v1 = vld [vmem:[%s2739_s5] sm:$0xff] (!%p1455_p10)   ;;  %v1776_v3 = vld [vmem:[%s2739_s5 + $0x8] sm:$0xff] (!%p1455_p10)   ;;  %1535 = vmatpush3.bf16.msra.mxu0 (!%p1455_p10), %v1775_v2 }
  0xaf   : > { %1540 = vmatprep.subr.bf16.mxu1 (!%p1455_p10), %v1774_v1 }
  0xb0   : > { %1541 = vmatpush3.bf16.msra.mxu1 %v1774_v1  ;;  %v1456_v7 = vld [vmem:[%s2740_s2] ss:$0 sm:$0xff] }
  0xb1   : > { %1542 = vmatprep.subr.bf16.mxu1 %v1776_v3  ;;  %1537 = vmatmul.mubr.msk.bf16.vlgmr.msra.gmra.mrb[0].mxu0 %vm452_vm0, %v1778_v5  ;;  %v1463_v9 = vld [vmem:[%s2741_s25] ss:$0 sm:$0xff] }
  0xb4   : > { %1543 = vmatpush3.bf16.msra.mxu1 %v1776_v3 }
  0xb7   : > { %1545 = vmatmul.mubr.msk.bf16.vlgmr.msra.gmra.mrb[0].mxu1 %vm452_vm0, %v1778_v5 }
 0x184   : > { %v1538_v6 = vpop.f32.mrb[0].mxu0 }
 0x185   : > { %v493_v10 = vpop.f32.mrb[1].mxu0  ;;  %v502_v13 = vadd.f32 %v1538_v6, %v1456_v7 }
 0x186   : > { %v1539_v12 = vpop.f32.mrb[2].mxu0  ;;  %v494_v18 = vadd.f32 %v1456_v7, %v493_v10 }
 0x187   : > { %v505_v14 = vadd.f32 %v1539_v12, %v1456_v7  ;;  %v496_v16 = vpop.f32.mrb[3].mxu0 }
 0x188   : > { %v497_v20 = vadd.f32 %v1456_v7, %v496_v16 }
 0x189   : > { %v509_v23 = vpack.c.bf16 %v505_v14, %v502_v13 }
 0x18a   : > { %v1546_v8 = vpop.f32.mrb[0].mxu1  ;;  %v508_v26 = vpack.c.bf16 %v497_v20, %v494_v18 }
 0x18b   : > { %v569_v11 = vpop.f32.mrb[1].mxu1  ;;  %v578_v17 = vadd.f32 %v1546_v8, %v1463_v9  ;;  %511 = vst.msk [vmem:[#allocation2 + $0x8] sm:$0xff] %vm452_vm0, %v509_v23 }
 0x18c   : > { %v1547_v15 = vpop.f32.mrb[2].mxu1  ;;  %v570_v22 = vadd.f32 %v1463_v9, %v569_v11  ;;  %510 = vst.msk [vmem:[#allocation2] sm:$0xff] %vm452_vm0, %v508_v26 }
 0x18d   : > { %v581_v19 = vadd.f32 %v1547_v15, %v1463_v9  ;;  %v572_v21 = vpop.f32.mrb[3].mxu1 }
 0x18e   : > { %v573_v24 = vadd.f32 %v1463_v9, %v572_v21 }
 0x18f   : > { %v585_v25 = vpack.c.bf16 %v581_v19, %v578_v17 }
 0x190   : > { %v584_v27 = vpack.c.bf16 %v573_v24, %v570_v22 }
 0x191   : > { %587 = vst.msk [vmem:[#allocation3 + $0x8] sm:$0xff] %vm452_vm0, %v585_v25 }
 0x192   : > { %586 = vst.msk [vmem:[#allocation3] sm:$0xff] %vm452_vm0, %v584_v27 }
 0x193 PF: > { %v1779_v28 = vld [vmem:[#allocation7] sm:$0xff]   ;;  %v2068_v29 = vmov 0.0   ;;  %v1780_v30 = vld [vmem:[#allocation7 + $0x8] sm:$0xff]   ;;  %vm2069_vm1 = vmmov 0   ;;  %s1468_s26 = sshll.u32 %s2044_s15, 4  ;;  %vm685_vm2 = vcmask 64512   ;;  %v669_v44 = vlaneseq }
 0x194   : > { %1548 = vmatprep.subr.bf16.mxu0 %v2068_v29  ;;  %1556 = vmatprep.subr.bf16.mxu1 %v2068_v29  ;;  %v2434_v31 = vld [vmem:[#allocation2] sm:$0xff]  ;;  %s589_s28 = sshra.s32 %s1468_s26, 3  ;;  %vm623_vm3 = vcmask 261120   ;;  %v2449_v34 = vld [vmem:[#allocation2 + $0x8] sm:$0xff]  ;;  %s2742_s22 = sld [smem:[#allocation22_spill]]  ;;  %v672_v46 = vstv %s1468_s26  ;;  %vm1231_vm6 = vcmask 130048  }
 0x195   : > { %1549 = vmatpush3.bf16.msra.mxu0 %v1779_v28  ;;  %1552 = vmatprep.mubr.msk.bf16.mxu0 %vm2069_vm1, %v2068_v29  ;;  %v690_v32 = vsel %vm685_vm2, %v2434_v31, 0  ;;  %s1469_s27 = sshll.u32 %s589_s28, 2  ;;  %v693_v35 = vsel %vm685_vm2, %v2449_v34, 0  ;;  %s2070_s6 = smov 120   ;;  %v670_v45 = vshrl.u32 %v669_v44, 7  ;;  %v676_v49 = vand.u32 127, %v669_v44 }
 0x196   : > { %1550 = vmatprep.subr.bf16.mxu0 %v2068_v29  ;;  %1560 = vmatprep.mubr.msk.bf16.mxu1 %vm2069_vm1, %v2068_v29  ;;  %s592_s24 = scalar_lea.vmem %s2387_s20, %s1469_s27 [#allocation4]  ;;  %v2071_v51 = vmov -1e+09   ;;  %s2072_s23 = smov 112   ;;  %vm1234_vm7 = vcmask 195584  }
 0x197   : > { %1557 = vmatpush3.bf16.xpose.msra.mxu1 %v690_v32  ;;  %v1781_v33 = vld [vmem:[%s592_s24] sm:$0xff]   ;;  %813 = vrot.lane.b32.xlu1 %v2434_v31, %s2070_s6  ;;  %v671_v47 = vadd.s32 8, %v670_v45  ;;  %v673_v48 = vadd.s32 %v672_v46, %v670_v45  ;;  %s2073_s29 = smov 104   ;;  %s2709_s2 = smov 8  }
 0x198   : > { %1558 = vmatprep.subr.bf16.mxu1 %v2068_v29  ;;  %v2483_v63 = vld [vmem:[#allocation3 + $0x8] sm:$0xff]  ;;  %s2075_s9 = smov 16   ;;  %s2743_s1 = sld [smem:[#allocation18_spill]] }
 0x199   : > { %1551 = vmatpush3.bf16.msra.mxu0 %v1780_v30  ;;  %v674_v50 = vadd.s32 %v672_v46, %v671_v47  ;;  %vm677_vm4 = vcmp.le.s32.totalorder %v676_v49, %v673_v48  ;;  %v2477_v62 = vld [vmem:[#allocation3] sm:$0xff]  ;;  %s2076_s25 = smov 24   ;;  %s1488_s26 = sshll.u32 %s2044_s15, 1 }
 0x19a   : > { %1564 = vmatprep.subr.bf16.mxu0 %v2068_v29  ;;  %v1470_v36 = vld [vmem:[%s2742_s22] ss:$0 sm:$0xff]  ;;  %v2469_v52 = vsel %vm677_vm4, 0.0, %v2071_v51  ;;  %s2744_s4 = sld [smem:[#allocation27_spill]]  ;;  %s2745_s22 = sld [smem:[#allocation19_spill]] }
 0x19b   : > { %815 = vrot.lane.b32.xlu1 %v2449_v34, %s2070_s6  ;;  %vm678_vm5 = vcmp.le.s32.totalorder %v676_v49, %v674_v50  ;;  %s2624_s15 = scalar_lea.sflag [#allocation6], %s406_s3 }
 0x19c   : > { %1553 = vmatmul.mubr.msk.bf16.vlgmr.msra.gmra.mrb[0].mxu0 %vm623_vm3, %v1781_v33  ;;  %v2471_v54 = vsel %vm678_vm5, 0.0, %v2071_v51 }
 0x19d   : > { %1568 = vmatprep.mubr.msk.bf16.mxu0 %vm2069_vm1, %v2068_v29  ;;  %1565 = vmatpush3.bf16.msra.mxu0 %v2477_v62 }
 0x19e   : > { %1566 = vmatprep.subr.bf16.mxu0 %v2068_v29  ;;  %s1489_s28 = sshll.u32 %s2743_s1, 2 }
 0x19f   : > { %1559 = vmatpush3.bf16.xpose.msra.mxu1 %v693_v35  ;;  %888 = vrot.lane.b32.xlu1 %v2477_v62, %s2070_s6  ;;  %s1318_s27 = sadd.s32 %s1489_s28, %s1488_s26  ;;  %s2077_s26 = smov [#allocation12]  }
 0x1a0   : > { %1580 = vmatprep.subr.bf16.mxu1 %v2068_v29  ;;  %p2747_p9 = scmp.ne.s32.totalorder %s2745_s22, 0  ;;  %s1934_s28 = sshll.u32 %s2077_s26, 4  ;;  %s1935_s28 = int_to_ptr.vmem [resolvable:$false] %s1934_s28 }
 0x1a1   : > { %1567 = vmatpush3.bf16.msra.mxu0 %v2483_v63 }
 0x1a2   : > { %1572 = vmatprep.subr.bf16.mxu0 %v2068_v29 }
 0x209   : > { %v814_v6 = vpop.permute.xlu1 %813 }
 0x20a   : > { %v821_v9 = vsel %vm685_vm2, %v814_v6, 0 }
 0x20d   : > { %v816_v11 = vpop.permute.xlu1 %815 }
 0x20e   : > { %v824_v12 = vsel %vm685_vm2, %v816_v11, 0 }
 0x211   : > { %v889_v14 = vpop.permute.xlu1 %888 }
 0x26f   : > { %v661_v37 = vpop.f32.mrb[0].mxu0 }
 0x270   : > { %v1554_v38 = vpop.f32.mrb[1].mxu0  ;;  %v662_v40 = vadd.f32 %v1470_v36, %v661_v37 }
 0x271   : > { %v664_v39 = vpop.f32.mrb[2].mxu0 }
 0x272   : > { %v665_v41 = vadd.f32 %v1470_v36, %v664_v39  ;;  %v1555_v42 = vpop.f32.mrb[3].mxu0 }
 0x274   : > { %v2457_v43 = vpack.c.bf16 %v665_v41, %v662_v40 }
 0x276   : > { %1561 = vmatmul.mubr.msk.bf16.vlgmr.msra.gmra.mrb[0].mxu1 %vm685_vm2, %v2457_v43 }
 0x277   : > { %1584 = vmatprep.mubr.msk.bf16.mxu1 %vm2069_vm1, %v2068_v29  ;;  %1581 = vmatpush3.bf16.msra.mxu1 %v889_v14 }
 0x278   : > { %1582 = vmatprep.subr.bf16.mxu1 %v2068_v29 }
 0x349   : > { %v729_v53 = vpop.f32.mrb[0].mxu1 }
 0x34a   : > { %v730_v55 = vadd.f32 %v729_v53, %v2469_v52  ;;  %v1562_v56 = vpop.f32.mrb[1].mxu1 }
 0x34b   : > { %v732_v57 = vpop.f32.mrb[2].mxu1 }
 0x34c   : > { %v733_v58 = vadd.f32 %v732_v57, %v2471_v54  ;;  %v1563_v59 = vpop.f32.mrb[3].mxu1  ;;  %v736_v60 = vsel %vm623_vm3, %v730_v55, -inf }
 0x34d   : > { %737 = vmax.xlane.f32.xlu0 %v736_v60 }
 0x34e   : > { %v739_v61 = vsel %vm623_vm3, %v733_v58, -inf }
 0x351   : > { %740 = vmax.xlane.f32.xlu0 %v739_v61 }
 0x367   : > { %809 = vrot.lane.b32.xlu0 %v2457_v43, %s2070_s6 }
 0x3da   : > { %v738_v0 = vpop.xlane.xlu0 %737 }
 0x3db   : > { %v742_v1 = vsub.f32 %v730_v55, %v738_v0 }
 0x3dd   : > { %v744_v2 = vmul.f32 1.442695, %v742_v1 }
 0x3de   : > { %v741_v3 = vpop.xlane.xlu0 %740 }
 0x3df   : > { %v743_v4 = vsub.f32 %v733_v58, %v741_v3  ;;  %1784 = vpow2.f32 %v744_v2 }
 0x3e1   : > { %v746_v5 = vmul.f32 1.442695, %v743_v4 }
 0x3e2   : > { %v810_v13 = vpop.permute.xlu0 %809 }
 0x3e3   : > { %1786 = vpow2.f32 %v746_v5 }
 0x3e9   : > { %v2489_v7 = vpop.eup %1784 }
 0x3ed   : > { %v2491_v8 = vpop.eup %1786 }
 0x3ee   : > { %v754_v10 = vpack.c.bf16 %v2491_v8, %v2489_v7 }
 0x3f0   : > { %1569 = vmatmul.mubr.msk.bf16.vlgmr.msra.gmra.mrb[4].mxu0 %vm623_vm3, %v754_v10 }
 0x3f1   : > { %1573 = vmatpush3.bf16.xpose.msra.mxu0 %v821_v9  ;;  %1576 = vmatprep.mubr.msk.bf16.mxu0 %vm2069_vm1, %v2068_v29 }
 0x3f2   : > { %1574 = vmatprep.subr.bf16.mxu0 %v2068_v29 }
 0x3f9   : > { %1575 = vmatpush3.bf16.xpose.msra.mxu0 %v824_v12 }
 0x3fa   : > { %1596 = vmatprep.subr.bf16.mxu0 %v2068_v29 }
 0x400   : > { %1577 = vmatmul.mubr.msk.bf16.vlgmr.msra.gmra.mrb[8].mxu0 %vm685_vm2, %v810_v13 }
 0x401   : > { %1600 = vmatprep.mubr.msk.bf16.mxu0 %vm2069_vm1, %v2068_v29 }
 0x4c3   : > { %v2506_v15 = vpop.f32.mrb[4].mxu0 }
 0x4c4   : > { %v1570_v16 = vpop.f32.mrb[5].mxu0 }
 0x4c5   : > { %v2508_v17 = vpop.f32.mrb[6].mxu0 }
 0x4c6   : > { %v1571_v18 = vpop.f32.mrb[7].mxu0 }
 0x4d3   : > { %v860_v19 = vpop.f32.mrb[8].mxu0 }
 0x4d4   : > { %v861_v20 = vadd.f32 %v860_v19, %v2469_v52  ;;  %v1578_v21 = vpop.f32.mrb[9].mxu0 }
 0x4d5   : > { %v863_v22 = vpop.f32.mrb[10].mxu0 }
 0x4d6   : > { %v864_v23 = vadd.f32 %v863_v22, %v2471_v54  ;;  %v1579_v24 = vpop.f32.mrb[11].mxu0  ;;  %v867_v25 = vsel %vm623_vm3, %v861_v20, -inf }
 0x4d7   : > { %868 = vmax.xlane.f32.xlu1 %v867_v25 }
 0x4d8   : > { %v870_v26 = vsel %vm623_vm3, %v864_v23, -inf }
 0x4d9   : > { %871 = vmax.xlane.f32.xlu0 %v870_v26 }
 0x4e8   : > { %951 = vrot.lane.b32.xlu1 %v2434_v31, %s2072_s23 }
 0x4ec   : > { %953 = vrot.lane.b32.xlu1 %v2449_v34, %s2072_s23 }
 0x4ef   : > { %890 = vrot.lane.b32.xlu0 %v2483_v63, %s2070_s6  ;;  %s1490_s6 = sshll.u32 %s1318_s27, 7  ;;  %s1936_s27 = scalar_lea.vmem %s1935_s28, 512 }
 0x4f0   : > { %947 = vrot.lane.b32.xlu1 %v2457_v43, %s2072_s23 }
 0x4f4   : > { %1026 = vrot.lane.b32.xlu1 %v2477_v62, %s2072_s23 }
 0x564   : > { %v869_v27 = vpop.xlane.xlu1 %868 }
 0x565   : > { %v873_v28 = vsub.f32 %v861_v20, %v869_v27 }
 0x566   : > { %v872_v30 = vpop.xlane.xlu0 %871 }
 0x567   : > { %v875_v32 = vmul.f32 1.442695, %v873_v28  ;;  %v874_v33 = vsub.f32 %v864_v23, %v872_v30 }
 0x568   : > { %v952_v39 = vpop.permute.xlu1 %951 }
 0x569   : > { %v877_v35 = vmul.f32 1.442695, %v874_v33  ;;  %1788 = vpow2.f32 %v875_v32  ;;  %v959_v40 = vsel %vm685_vm2, %v952_v39, 0 }
 0x56a   : > { %v891_v36 = vpop.permute.xlu0 %890 }
 0x56b   : > { %1790 = vpow2.f32 %v877_v35  ;;  %1583 = vmatpush3.bf16.msra.mxu1 %v891_v36 }
 0x56c   : > { %1588 = vmatprep.subr.bf16.mxu1 %v2068_v29  ;;  %v954_v42 = vpop.permute.xlu1 %953 }
 0x56d   : > { %v962_v44 = vsel %vm685_vm2, %v954_v42, 0 }
 0x570   : > { %v948_v45 = vpop.permute.xlu1 %947 }
 0x573   : > { %v2525_v37 = vpop.eup %1788 }
 0x574   : > { %v1027_v46 = vpop.permute.xlu1 %1026 }
 0x575   : > { %v2527_v38 = vpop.eup %1790  ;;  %1597 = vmatpush3.bf16.msra.mxu0 %v1027_v46 }
 0x576   : > { %v885_v41 = vpack.c.bf16 %v2527_v38, %v2525_v37  ;;  %1598 = vmatprep.subr.bf16.mxu0 %v2068_v29 }
 0x578   : > { %1585 = vmatmul.mubr.msk.bf16.vlgmr.msra.gmra.mrb[4].mxu1 %vm623_vm3, %v885_v41 }
 0x579   : > { %1589 = vmatpush3.bf16.xpose.msra.mxu1 %v959_v40  ;;  %1592 = vmatprep.mubr.msk.bf16.mxu1 %vm2069_vm1, %v2068_v29 }
 0x57a   : > { %1590 = vmatprep.subr.bf16.mxu1 %v2068_v29 }
 0x581   : > { %1591 = vmatpush3.bf16.xpose.msra.mxu1 %v962_v44  ;;  %v748_v44 = vsel %vm623_vm3, %v2489_v7, 0.0 }
 0x582   : > { %1612 = vmatprep.subr.bf16.mxu1 %v2068_v29 }
 0x588   : > { %1593 = vmatmul.mubr.msk.bf16.vlgmr.msra.gmra.mrb[8].mxu1 %vm685_vm2, %v948_v45  ;;  %v751_v45 = vsel %vm623_vm3, %v2491_v8, 0.0 }
 0x589   : > { %1616 = vmatprep.mubr.msk.bf16.mxu1 %vm2069_vm1, %v2068_v29 }
 0x64b   : > { %v2542_v47 = vpop.f32.mrb[4].mxu1 }
 0x64c   : > { %v1586_v48 = vpop.f32.mrb[5].mxu1 }
 0x64d   : > { %v2544_v49 = vpop.f32.mrb[6].mxu1 }
 0x64e   : > { %v1587_v50 = vpop.f32.mrb[7].mxu1 }
 0x65b   : > { %v998_v51 = vpop.f32.mrb[8].mxu1 }
 0x65c   : > { %v999_v53 = vadd.f32 %v998_v51, %v2469_v52  ;;  %v1594_v55 = vpop.f32.mrb[9].mxu1 }
 0x65d   : > { %v1001_v56 = vpop.f32.mrb[10].mxu1 }
 0x65e   : > { %v1002_v57 = vadd.f32 %v1001_v56, %v2471_v54  ;;  %v1595_v58 = vpop.f32.mrb[11].mxu1  ;;  %v1005_v59 = vsel %vm623_vm3, %v999_v53, -inf }
 0x65f   : > { %1006 = vmax.xlane.f32.xlu1 %v1005_v59 }
 0x660   : > { %v1008_v60 = vsel %vm623_vm3, %v1002_v57, -inf }
 0x661   : > { %1009 = vmax.xlane.f32.xlu0 %v1008_v60 }
 0x670   : > { %1089 = vrot.lane.b32.xlu1 %v2434_v31, %s2073_s29 }
 0x674   : > { %1091 = vrot.lane.b32.xlu1 %v2449_v34, %s2073_s29 }
 0x677   : > { %1028 = vrot.lane.b32.xlu0 %v2483_v63, %s2072_s23  ;;  %s1321_s23 = sshll.u32 %s2404_s30, 4  ;;  %s2618_s23 = int_to_ptr.vmem [resolvable:$true] %s1321_s23 }
 0x678   : > { %1085 = vrot.lane.b32.xlu1 %v2457_v43, %s2073_s29  ;;  %s1930_s1 = scalar_lea.vmem %s2618_s23, 256  ;;  %p1937_p6 = scmp.lt.s32.totalorder %s2618_s23, %s1935_s28 }
 0x679   : > { %p1931_p2 = scmp.ne.s32.totalorder %s2618_s23, %s1930_s1  ;;  %p1938_p8 = scmp.lt.s32.totalorder %s1936_s27, %s1930_s1 }
 0x67b   : > { %p1932_p5 = pnand %p1931_p2, %p2747_p9  ;;  %p1939_p12 = por %p1938_p8, %p1937_p6 }
 0x67d   : > { %p1933_p13 = pneg %p1932_p5 }
 0x67f   : > { %p1940_p4 = pnand %p1939_p12, %p1933_p13 }
 0x6ec   : > { %v1007_v61 = vpop.xlane.xlu1 %1006 }
 0x6ed   : > { %v1011_v0 = vsub.f32 %v999_v53, %v1007_v61 }
 0x6ee   : > { %v1010_v1 = vpop.xlane.xlu0 %1009 }
 0x6ef   : > { %v1013_v2 = vmul.f32 1.442695, %v1011_v0  ;;  %v1012_v3 = vsub.f32 %v1002_v57, %v1010_v1  ;;  %v1782_v0 = vld [vmem:[#allocation10] sm:$0xff]   ;;  %v1783_v1 = vld [vmem:[#allocation10 + $0x8] sm:$0xff]  }
 0x6f0   : > { %v1090_v6 = vpop.permute.xlu1 %1089 }
 0x6f1   : > { %v1015_v4 = vmul.f32 1.442695, %v1012_v3  ;;  %1792 = vpow2.f32 %v1013_v2  ;;  %v1097_v9 = vsel %vm685_vm2, %v1090_v6, 0 }
 0x6f2   : > { %v1029_v5 = vpop.permute.xlu0 %1028 }
 0x6f3   : > { %1794 = vpow2.f32 %v1015_v4  ;;  %1599 = vmatpush3.bf16.msra.mxu0 %v1029_v5 }
 0x6f4   : > { %1604 = vmatprep.subr.bf16.mxu0 %v2068_v29  ;;  %v1092_v43 = vpop.permute.xlu1 %1091 }
 0x6f5   : > { %v1100_v11 = vsel %vm685_vm2, %v1092_v43, 0 }
 0x6f8   : > { %v1086_v12 = vpop.permute.xlu1 %1085 }
 0x6fb   : > { %v1793_v31 = vpop.eup %1792 }
 0x6fc   : > { %v1017_v27 = vsel %vm623_vm3, %v1793_v31, 0.0 }
 0x6fd   : > { %v1795_v34 = vpop.eup %1794 }
 0x6fe   : > { %v1023_v10 = vpack.c.bf16 %v1795_v34, %v1793_v31  ;;  %v1020_v28 = vsel %vm623_vm3, %v1795_v34, 0.0 }
 0x700   : > { %1601 = vmatmul.mubr.msk.bf16.vlgmr.msra.gmra.mrb[12].mxu0 %vm623_vm3, %v1023_v10 }
 0x701   : > { %1605 = vmatpush3.bf16.xpose.msra.mxu0 %v1097_v9  ;;  %1608 = vmatprep.mubr.msk.bf16.mxu0 %vm2069_vm1, %v2068_v29 }
 0x702   : > { %1606 = vmatprep.subr.bf16.mxu0 %v2068_v29 }
 0x709   : > { %1607 = vmatpush3.bf16.xpose.msra.mxu0 %v1100_v11 }
 0x710   : > { %1609 = vmatmul.mubr.msk.bf16.vlgmr.msra.gmra.mrb[16].mxu0 %vm685_vm2, %v1086_v12 }
 0x7d3   : > { %v2566_v13 = vpop.f32.mrb[12].mxu0 }
 0x7d4   : > { %v1602_v14 = vpop.f32.mrb[13].mxu0 }
 0x7d5   : > { %v2568_v16 = vpop.f32.mrb[14].mxu0 }
 0x7d6   : > { %v1603_v18 = vpop.f32.mrb[15].mxu0 }
 0x7e3   : > { %v1136_v19 = vpop.f32.mrb[16].mxu0 }
 0x7e4   : > { %v1137_v20 = vadd.f32 %v1136_v19, %v2469_v52  ;;  %v1610_v21 = vpop.f32.mrb[17].mxu0  ;;  %v879_v52 = vsel %vm623_vm3, %v2525_v37, 0.0 }
 0x7e5   : > { %v1139_v22 = vpop.f32.mrb[18].mxu0 }
 0x7e6   : > { %v1140_v23 = vadd.f32 %v1139_v22, %v2471_v54  ;;  %v1611_v24 = vpop.f32.mrb[19].mxu0  ;;  %v1143_v25 = vsel %vm623_vm3, %v1137_v20, -inf  ;;  %v882_v54 = vsel %vm623_vm3, %v2527_v38, 0.0  ;;  %v1483_v22 = vld [vmem:[%s2744_s4] ss:$0 sm:$0xff] }
 0x7e7   : > { %1144 = vmax.xlane.f32.xlu0 %v1143_v25 }
 0x7e8   : > { %v1146_v26 = vsel %vm623_vm3, %v1140_v23, -inf }
 0x7e9   : > { %1147 = vmax.xlane.f32.xlu1 %v1146_v26 }
 0x7fa   : > { %1166 = vrot.lane.b32.xlu1 %v2483_v63, %s2073_s29 }
 0x7fd   : > { %1164 = vrot.lane.b32.xlu0 %v2477_v62, %s2073_s29 }
 0x81c   : > { %880 = vadd.xlane.f32.xlu0 %v879_v52 }
 0x81e   : > { %883 = vadd.xlane.f32.xlu1 %v882_v54 }
 0x820   : > { %1018 = vadd.xlane.f32.xlu0 %v1017_v27 }
 0x824   : > { %1021 = vadd.xlane.f32.xlu0 %v1020_v28 }
 0x874   : > { %v1145_v30 = vpop.xlane.xlu0 %1144 }
 0x875   : > { %v1149_v32 = vsub.f32 %v1137_v20, %v1145_v30 }
 0x876   : > { %v1148_v63 = vpop.xlane.xlu1 %1147 }
 0x877   : > { %v1151_v33 = vmul.f32 1.442695, %v1149_v32  ;;  %v1150_v35 = vsub.f32 %v1140_v23, %v1148_v63 }
 0x878   : > { %v1165_v62 = vpop.permute.xlu0 %1164 }
 0x879   : > { %1796 = vpow2.f32 %v1151_v33  ;;  %v1153_v36 = vmul.f32 1.442695, %v1150_v35  ;;  %1613 = vmatpush3.bf16.msra.mxu1 %v1165_v62 }
 0x87a   : > { %1614 = vmatprep.subr.bf16.mxu1 %v2068_v29  ;;  %v1167_v37 = vpop.permute.xlu1 %1166 }
 0x87b   : > { %1798 = vpow2.f32 %v1153_v36 }
 0x87d   : > { %1615 = vmatpush3.bf16.msra.mxu1 %v1167_v37 }
 0x87e   : > { %1620 = vmatprep.subr.bf16.mxu1 %v2068_v29 }
 0x883   : > { %v1797_v38 = vpop.eup %1796 }
 0x884   : > { %v1155_v39 = vsel %vm623_vm3, %v1797_v38, 0.0 }
 0x885   : > { %v1799_v40 = vpop.eup %1798  ;;  %1156 = vadd.xlane.f32.xlu1 %v1155_v39 }
 0x886   : > { %v1158_v41 = vsel %vm623_vm3, %v1799_v40, 0.0  ;;  %v1161_v42 = vpack.c.bf16 %v1799_v40, %v1797_v38 }
 0x887   : > { %1159 = vadd.xlane.f32.xlu0 %v1158_v41 }
 0x888   : > { %1617 = vmatmul.mubr.msk.bf16.vlgmr.msra.gmra.mrb[12].mxu1 %vm623_vm3, %v1161_v42 }
 0x889   : > { %749 = vadd.xlane.f32.xlu1 %v748_v44  ;;  %1624 = vmatprep.mubr.msk.bf16.mxu1 %vm2069_vm1, %v2068_v29 }
 0x88a   : > { %1621 = vmatpush3.bf16.msra.mxu1 %v1782_v0 }
 0x88b   : > { %752 = vadd.xlane.f32.xlu0 %v751_v45  ;;  %1622 = vmatprep.subr.bf16.mxu1 %v2068_v29 }
 0x88e   : > { %1623 = vmatpush3.bf16.msra.mxu1 %v1783_v1 }
 0x8a9   : > { %v881_v46 = vpop.xlane.xlu0 %880 }
 0x8aa   : > { %1800 = vrcp.f32 %v881_v46 }
 0x8ab   : > { %v884_v48 = vpop.xlane.xlu1 %883 }
 0x8ac   : > { %1802 = vrcp.f32 %v884_v48 }
 0x8ad   : > { %v1019_v50 = vpop.xlane.xlu0 %1018 }
 0x8ae   : > { %1804 = vrcp.f32 %v1019_v50 }
 0x8b1   : > { %v1022_v51 = vpop.xlane.xlu0 %1021 }
 0x8b2   : > { %1806 = vrcp.f32 %v1022_v51 }
 0x8b4   : > { %v1801_v53 = vpop.eup %1800 }
 0x8b5   : > { %v940_v7 = vmul.f32 %v1801_v53, %v2542_v47 }
 0x8b6   : > { %v1803_v55 = vpop.eup %1802 }
 0x8b7   : > { %v941_v56 = vmul.f32 %v1803_v55, %v2544_v49 }
 0x8b8   : > { %v1805_v58 = vpop.eup %1804 }
 0x8b9   : > { %v942_v57 = vpack.c.bf16 %v941_v56, %v940_v7  ;;  %v1078_v59 = vmul.f32 %v1805_v58, %v2566_v13 }
 0x8bb   : > { %1220 = vrot.lane.b32.xlu1 %v942_v57, %s2709_s2 }
 0x8bc   : > { %v1807_v8 = vpop.eup %1806 }
 0x8bd   : > { %v1079_v60 = vmul.f32 %v1807_v8, %v2568_v16 }
 0x8bf   : > { %v1080_v61 = vpack.c.bf16 %v1079_v60, %v1078_v59 }
 0x8c1   : > { %1223 = vrot.lane.b32.xlu0 %v1080_v61, %s2075_s9 }
 0x912   : > { %v1157_v47 = vpop.xlane.xlu1 %1156 }
 0x914   : > { %v1160_v49 = vpop.xlane.xlu0 %1159 }
 0x916   : > { %v750_v2 = vpop.xlane.xlu1 %749 }
 0x917   : > { %1808 = vrcp.f32 %v750_v2 }
 0x918   : > { %v753_v3 = vpop.xlane.xlu0 %752 }
 0x919   : > { %1810 = vrcp.f32 %v753_v3 }
 0x91a   : > { %1812 = vrcp.f32 %v1157_v47 }
 0x91b   : > { %1814 = vrcp.f32 %v1160_v49 }
 0x921   : > { %v1809_v4 = vpop.eup %1808 }
 0x922   : > { %v801_v31 = vmul.f32 %v1809_v4, %v2506_v15 }
 0x923   : > { %v1811_v5 = vpop.eup %1810 }
 0x924   : > { %v802_v34 = vmul.f32 %v1811_v5, %v2508_v17  ;;  %v1813_v10 = vpop.eup %1812 }
 0x925   : > { %v1815_v29 = vpop.eup %1814 }
 0x926   : > { %v803_v6 = vpack.c.bf16 %v802_v34, %v801_v31 }
 0x92d   : > { %v1221_v15 = vpop.permute.xlu1 %1220 }
 0x92e   : > { %v1230_v18 = vsel %vm685_vm2, %v803_v6, %v1221_v15 }
 0x933   : > { %v1224_v17 = vpop.permute.xlu0 %1223 }
 0x934   : > { %v1233_v19 = vsel %vm1231_vm6, %v1230_v18, %v1224_v17 }
 0x95b   : > { %v1207_v9 = vpop.f32.mrb[12].mxu1 }
 0x95c   : > { %v1618_v43 = vpop.f32.mrb[13].mxu1  ;;  %v1216_v12 = vmul.f32 %v1813_v10, %v1207_v9 }
 0x95d   : > { %v1210_v11 = vpop.f32.mrb[14].mxu1 }
 0x95e   : > { %v1217_v13 = vmul.f32 %v1815_v29, %v1210_v11  ;;  %v1619_v14 = vpop.f32.mrb[15].mxu1 }
 0x960   : > { %v1218_v16 = vpack.c.bf16 %v1217_v13, %v1216_v12 }
 0x962   : > { %1226 = vrot.lane.b32.xlu1 %v1218_v16, %s2076_s25  ;;  %s2746_s25 = sld [smem:[#allocation28_spill]] }
 0x968   : > { %s2614_s2 = scalar_lea.hbm %s2746_s25, %s1490_s6 }
 0x9d4   : > { %v1227_v20 = vpop.permute.xlu1 %1226 }
 0x9d5   : > { %v1236_v21 = vsel %vm1234_vm7, %v1233_v19, %v1227_v20 }
 0x9d6   : > { %1625 = vmatmul.mubr.msk.bf16.vlgmr.msra.gmra.mrb[16].mxu1 %vm623_vm3, %v1236_v21 }
 0xaa9   : > { %v1296_v23 = vpop.f32.mrb[16].mxu1 }
 0xaaa   : > { %v1297_v24 = vadd.f32 %v1483_v22, %v1296_v23  ;;  %v1626_v25 = vpop.f32.mrb[17].mxu1 }
 0xaab   : > { %v1299_v26 = vpop.f32.mrb[18].mxu1 }
 0xaac   : > { %1303 = vst.msk [vmem:[%s2404_s30] sm:$0xff] %vm623_vm3, %v1297_v24  ;;  %v1300_v52 = vadd.f32 %v1483_v22, %v1299_v26  ;;  %v1627_v54 = vpop.f32.mrb[19].mxu1 }
 0xaae   : > { %1304 = vst.msk [vmem:[%s2404_s30 + $0x8] sm:$0xff] %vm623_vm3, %v1300_v52 }
 0xaaf   : > { %1943 = shalt.err (!%p1940_p4)
}
 0xab0   : > { %s1944_s3 = scalar_lea.hbm %s2614_s2, 256  ;;  %s1948_s20 = scalar_lea.hbm %s2746_s25, 1024 }
 0xab1   : > { %p1945_p7 = scmp.ne.s32.totalorder %s2614_s2, %s1944_s3  ;;  %p1949_p1 = scmp.lt.u32.totalorder %s2614_s2, %s2746_s25 }
 0xab2   : > { %p1950_p11 = scmp.lt.u32.totalorder %s1948_s20, %s1944_s3  ;;  %p1952_p2 = scmp.lt.u32.totalorder %s1944_s3, %s2614_s2 }
 0xab3   : > { %p1946_p3 = pnand %p1945_p7, %p2747_p9 }
 0xab4   : > { %p1951_p10 = por %p1950_p11, %p1949_p1 }
 0xab5   : > { %p1947_p0 = pneg %p1946_p3 }
 0xab6   : > { %p1953_p5 = por %p1952_p2, %p1951_p10 }
 0xab8   : > { %p1954_p13 = pnand %p1953_p5, %p1947_p0 }
 0xaba   : > { %1957 = shalt.err (!%p1954_p13)
}
 0xabb   : > { %s2078_s29 = smov 128   ;;  %s2748_s9 = smov 8  }
 0xabc   : > { %1642 = dma.vmem_to_hbm [thread:$0]  (%p2747_p9), %s2618_s23, 256, %s2614_s2, %s2624_s15, %s2078_s29, %s2078_s29, %s2748_s9  }
 0xabd PF: > { %s2749_s1 = sld [smem:[#allocation17_spill]]  ;;  %s2750_s26 = sld [smem:[#allocation20_spill]] }
 0xabe   : > { %p1669_p6 = scmp.ge.s32.totalorder %s2060_s19, 2 }
 0xac3   : > { %s1336_s28 = sand.u32 1, %s2749_s1   ;;  %p2751_p8 = scmp.ne.s32.totalorder %s2750_s26, 0 }
 0xac4   : > { %s1337_s27 = scalar_lea.sflag [#allocation6], %s1336_s28 }
 0xac5   : > { %p1659_p12 = pnand %p1669_p6, %p2751_p8 }
 0xac7   : > { %2015 = dma.done.wait (!%p1659_p12), %s1337_s27, 256  }
 0xac8   : > { %2017 = vsyncadd (!%p1659_p12), %s1337_s27, 4294967040  ;;  %s27_s19 = sadd.s32 1, %s2060_s19   ;;  %s2752_s2 = smov %s2765_s16 }
 0xac9   : > { %p24_p4 = scmp.ge.s32.totalorder %s27_s19, 6   ;;  %s2753_s22 = smov %s2769_s12 }
 0xaca   : > { %s2754_s30 = smov %s2024_s10  ;;  %s2755_s10 = smov %s2028_s11 }
 0xacb   : > { %s2756_s11 = smov %s2336_s21  ;;  %s2757_s12 = smov %s2036_s13 }
 0xacc   : > { %s2758_s13 = smov %s2040_s14  ;;  %s2759_s14 = smov %s2331_s8 }
 0xacd   : > { %s2760_s15 = smov %s2052_s17  ;;  %s2761_s16 = smov %s2056_s18 }
 0xace   : > { %s2762_s17 = smov %s2752_s2  ;;  %s2763_s18 = smov %s2753_s22 }
 0xacf   :  { %26 = sbr.rel (!%p24_p4) target bundleno = 20 (0x14), region = 118 }
 0xad6   :  { %1342 = vsyncpa [#allocation5], 1 }
 0xad7   :  { %1344 = vsyncpa [#allocation5 + $0x1], 1 }
 0xad8   :  { %1345 = vsyncpa [#allocation8], 1 }
 0xad9   :  { %1346 = vsyncpa [#allocation11], 1 }
 0xada   :  { %1347 = vsyncpa [#allocation6], 1 }
 0xadb   :  { %1349 = vsyncpa [#allocation6 + $0x1], 1 }

// kernel: tpu_custom_call.1
= control target key start
LH: loop header
LB: loop body
LE: loop exit
PB: predicated region body
PF: predicated region fallthrough
CT: control target
= control target key end

     0   :  { %s2686_s0 = inlined_call_operand.hbm [shape: bf16[2,32,32], index: 0, kind: input, shape index: {}]   ;;  %s2687_s1 = inlined_call_operand.hbm [shape: bf16[32,32], index: 1, kind: input, shape index: {}]   ;;  %s2688_s2 = inlined_call_operand.vmem [shape: f32[1,32], index: 2, kind: input, shape index: {}]   ;;  %s2689_s3 = inlined_call_operand.hbm [shape: bf16[32,32], index: 3, kind: input, shape index: {}]   ;;  %s2690_s4 = inlined_call_operand.vmem [shape: f32[1,32], index: 4, kind: input, shape index: {}]   ;;  %s2691_s5 = inlined_call_operand.vmem [shape: bf16[32,32], index: 5, kind: input, shape index: {}]   ;;  %s2692_s6 = inlined_call_operand.vmem [shape: f32[1,32], index: 6, kind: input, shape index: {}]   ;;  %s2693_s7 = inlined_call_operand.hbm [shape: bf16[32,32], index: 7, kind: input, shape index: {}]   ;;  %s2694_s8 = inlined_call_operand.vmem [shape: f32[1,32], index: 8, kind: input, shape index: {}]   ;;  %s2695_s9 = inlined_call_operand.hbm [shape: f32[2,32,32], index: 9, kind: output, shape index: {}]  }
   0x1   :  { %2710 = sst [smem:[#allocation21_spill]] %s2687_s1 }
   0x2   :  { %2711 = sst [smem:[#allocation22_spill]] %s2688_s2 }
   0x3   :  { %2712 = sst [smem:[#allocation23_spill]] %s2689_s3 }
   0x4   :  { %2713 = sst [smem:[#allocation24_spill]] %s2690_s4 }
   0x5   :  { %2714 = sst [smem:[#allocation25_spill]] %s2691_s5 }
   0x6   :  { %2715 = sst [smem:[#allocation26_spill]] %s2692_s6 }
   0x7   :  { %2716 = sst [smem:[#allocation27_spill]] %s2694_s8 }
   0x8   :  { %2717 = sst [smem:[#allocation28_spill]] %s2695_s9 }
   0x9   :  { %14 = vsyncpa [#allocation5], 0 }
   0xa   :  { %16 = vsyncpa [#allocation5 + $0x1], 0 }
   0xb   :  { %17 = vsyncpa [#allocation8], 0 }
   0xc   :  { %18 = vsyncpa [#allocation11], 0 }
   0xd   :  { %19 = vsyncpa [#allocation6], 0 }
   0xe   :  { %21 = vsyncpa [#allocation6 + $0x1], 0  ;;  %s2129_s30 = smov 0   ;;  %s2131_s10 = smov 0  }
   0xf   :  { %s2133_s11 = smov 0   ;;  %s2135_s12 = smov 0  }
  0x10   :  { %s2137_s13 = smov 0   ;;  %s2139_s14 = smov 0  }
  0x11   :  { %s2141_s15 = smov 0   ;;  %s2143_s16 = smov 0  }
  0x12   :  { %s2145_s17 = smov 0   ;;  %s2147_s18 = smov 0  }
  0x13   :  { %s2149_s19 = smov 0  }
  0x14 LB: > { %2718 = sst [smem:[#allocation17_spill]] %s2020_s30  ;;  %s1439_s20 = sadd.s32 4294967295, %s2060_s19   ;;  %s2060_s19 = sphi %s2149_s19, %s27_s19   ;;  %s2056_s18 = sphi %s2147_s18, %s2763_s18   ;;  %s2052_s17 = sphi %s2145_s17, %s2762_s17   ;;  %s2048_s16 = sphi %s2143_s16, %s2761_s16   ;;  %s2044_s15 = sphi %s2141_s15, %s2760_s15   ;;  %s2040_s14 = sphi %s2139_s14, %s2759_s14   ;;  %s2036_s13 = sphi %s2137_s13, %s2758_s13   ;;  %s2032_s12 = sphi %s2135_s12, %s2757_s12   ;;  %s2028_s11 = sphi %s2133_s11, %s2756_s11   ;;  %s2024_s10 = sphi %s2131_s10, %s2755_s10   ;;  %s2020_s30 = sphi %s2129_s30, %s2754_s30  }
  0x15   : > { %2719 = sst [smem:[#allocation18_spill]] %s2048_s16  ;;  %s1440_s21 = sadd.s32 4294967294, %s2060_s19  }
  0x16   : > { %p59_p0 = scmp.ne.s32.totalorder %s2036_s13, %s2032_s12  ;;  %p2185_p1 = scmp.eq.s32.totalorder %s1439_s20, 0 }
  0x17   : > { %p252_p2 = scmp.ne.s32.totalorder %s2028_s11, %s2024_s10  ;;  %p253_p4 = scmp.eq.s32.totalorder %s1439_s20, 3 }
  0x18   : > { %s2720_s22 = scalar_select %p2185_p1, 1, 0 }
  0x19   : > { %p2194_p3 = por %p2185_p1, %p59_p0  ;;  %p258_p5 = scmp.ne.s32.totalorder %s2024_s10, %s2020_s30 }
  0x1a   : > { %p259_p6 = scmp.eq.s32.totalorder %s1440_s21, 3  ;;  %p2200_p7 = por %p253_p4, %p252_p2 }
  0x1b   : > { %s2721_s24 = scalar_select %p2194_p3, 1, 0 }
  0x1c   : > { %s2722_s25 = scalar_select %p2200_p7, 1, 0 }
  0x1d   : > { %p1441_p8 = scmp.ge.s32.totalorder %s2060_s19, 1  ;;  %p2205_p9 = por %p259_p6, %p258_p5 }
  0x1e   : > { %2723 = sst [smem:[#allocation19_spill]] %s2722_s25  ;;  %p266_p10 = scmp.lt.s32.totalorder %s2060_s19, 5 }
  0x1f   : > { %s2724_s26 = scalar_select %p2205_p9, 1, 0 }
  0x20   : > { %p2210_p11 = pnand %p1441_p8, %p266_p10  ;;  %s2062_s28 = smov [#allocation7]  }
  0x21   : > { %2725 = sst [smem:[#allocation20_spill]] %s2724_s26  ;;  %s278_s29 = sshll.u32 %s2062_s28, 4  ;;  %s2214_s29 = int_to_ptr.vmem [resolvable:$true] %s278_s29 }
  0x22   : > { %s2726_s27 = scalar_select %p2210_p11, 1, 0 }
  0x23   : > { %p1644_p12 = pneg %p2210_p11  ;;  %s2063_s20 = smov [#allocation9]  }
  0x24   : > { %s294_s21 = sshll.u32 %s2063_s20, 4  ;;  %s2064_s23 = smov [#allocation10]   ;;  %s2224_s21 = int_to_ptr.vmem [resolvable:$true] %s294_s21 }
  0x25   : > { %p2220_p13 = pnand %p1644_p12, %p2185_p1  ;;  %s2226_s26 = sshll.u32 %s2064_s23, 4  ;;  %s317_s26 = int_to_ptr.vmem [resolvable:$true] %s2226_s26 }
  0x26   : > { %s2728_s1 = sld [smem:[#allocation21_spill]] }
  0x27   : > { %p2236_p2 = pneg %p2220_p13 }
  0x2c   : > { %s1816_s28 = scalar_lea.hbm %s2728_s1, 256 }
  0x2d   : > { %p1817_p0 = scmp.ne.s32.totalorder %s2728_s1, %s1816_s28  ;;  %p1823_p6 = scmp.lt.u32.totalorder %s1816_s28, %s2728_s1 }
  0x2f   : > { %p1819_p4 = pnand %p2236_p2, %p1817_p0 }
  0x31   : > { %p1820_p5 = pneg %p1819_p4 }
  0x33   : > { %p1825_p8 = pnand %p1823_p6, %p1820_p5 }
  0x35   : > { %1828 = shalt.err (!%p1825_p8)
}
  0x36   : > { %s1829_s8 = scalar_lea.vmem %s2214_s29, 256  ;;  %p1837_p7 = scmp.lt.s32.totalorder %s2214_s29, %s2214_s29 }
  0x37   : > { %p1830_p10 = scmp.ne.s32.totalorder %s2214_s29, %s1829_s8  ;;  %p1838_p1 = scmp.lt.s32.totalorder %s1829_s8, %s1829_s8 }
  0x39   : > { %p1832_p12 = pnand %p1830_p10, %p2236_p2  ;;  %p1839_p0 = por %p1838_p1, %p1837_p7 }
  0x3b   : > { %p1833_p9 = pneg %p1832_p12 }
  0x3d   : > { %p1840_p4 = pnand %p1839_p0, %p1833_p9 }
  0x3f   : > { %1843 = shalt.err (!%p1840_p4)
}
  0x40   : > { %s2707_s9 = smov 64   ;;  %s2708_s30 = smov 4  }
  0x41   : > { %1647 = dma.hbm_to_vmem [thread:$0]  (!%p2220_p13), %s2728_s1, 256, %s2214_s29, [#allocation8], %s2707_s9, %s2707_s9, %s2708_s30  }
  0x42   : > { %s2730_s3 = sld [smem:[#allocation23_spill]] }
  0x48   : > { %s1844_s8 = scalar_lea.hbm %s2730_s3, 256 }
  0x49   : > { %p1845_p1 = scmp.ne.s32.totalorder %s2730_s3, %s1844_s8  ;;  %p1851_p5 = scmp.lt.u32.totalorder %s1844_s8, %s2730_s3 }
  0x4b   : > { %p1847_p7 = pnand %p1845_p1, %p2236_p2 }
  0x4d   : > { %p1848_p9 = pneg %p1847_p7 }
  0x4f   : > { %p1853_p6 = pnand %p1851_p5, %p1848_p9 }
  0x51   : > { %1856 = shalt.err (!%p1853_p6)
}
  0x52   : > { %s1857_s29 = scalar_lea.vmem %s2224_s21, 256  ;;  %p1865_p0 = scmp.lt.s32.totalorder %s2224_s21, %s2224_s21 }
  0x53   : > { %p1858_p8 = scmp.ne.s32.totalorder %s2224_s21, %s1857_s29  ;;  %p1866_p4 = scmp.lt.s32.totalorder %s1857_s29, %s1857_s29 }
  0x55   : > { %p1860_p10 = pnand %p1858_p8, %p2236_p2  ;;  %p1867_p1 = por %p1866_p4, %p1865_p0 }
  0x57   : > { %p1861_p12 = pneg %p1860_p10 }
  0x59   : > { %p1868_p7 = pnand %p1867_p1, %p1861_p12 }
  0x5b   : > { %1871 = shalt.err (!%p1868_p7)
}
  0x5c   : > { %1650 = dma.hbm_to_vmem [thread:$0]  (!%p2220_p13), %s2730_s3, 256, %s2224_s21, [#allocation8], %s2707_s9, %s2707_s9, %s2708_s30  }
  0x5d   : > { %s1872_s25 = scalar_lea.hbm %s2693_s7, 256 }
  0x5e   : > { %p1873_p9 = scmp.ne.s32.totalorder %s2693_s7, %s1872_s25  ;;  %p1879_p8 = scmp.lt.u32.totalorder %s1872_s25, %s2693_s7 }
  0x60   : > { %p1875_p5 = pnand %p1873_p9, %p2236_p2 }
  0x62   : > { %p1876_p6 = pneg %p1875_p5 }
  0x64   : > { %p1881_p10 = pnand %p1879_p8, %p1876_p6 }
  0x66   : > { %1884 = shalt.err (!%p1881_p10)
}
  0x67   : > { %s1885_s29 = scalar_lea.vmem %s317_s26, 256  ;;  %p1893_p1 = scmp.lt.s32.totalorder %s317_s26, %s317_s26 }
  0x68   : > { %p1886_p12 = scmp.ne.s32.totalorder %s317_s26, %s1885_s29  ;;  %p1894_p7 = scmp.lt.s32.totalorder %s1885_s29, %s1885_s29 }
  0x6a   : > { %p1888_p0 = pnand %p1886_p12, %p2236_p2  ;;  %p1895_p3 = por %p1894_p7, %p1893_p1 }
  0x6c   : > { %p1889_p4 = pneg %p1888_p0 }
  0x6e   : > { %p1896_p11 = pnand %p1895_p3, %p1889_p4 }
  0x70   : > { %1899 = shalt.err (!%p1896_p11)
}
  0x71   : > { %1653 = dma.hbm_to_vmem [thread:$0]  (!%p2220_p13), %s2693_s7, 256, %s317_s26, [#allocation11], %s2707_s9, %s2707_s9, %s2708_s30  }
  0x72   : > { %s36_s16 = sadd.s32 1, %s2052_s17  ;;  %s39_s12 = sadd.s32 1, %s2056_s18 }
  0x73   : > { %p37_p3 = scmp.ge.s32.totalorder %s36_s16, 2  ;;  %s46_s4 = sadd.s32 1, %s2040_s14 }
  0x74   : > { %p53_p11 = scmp.ne.s32.totalorder %s2040_s14, %s2036_s13  ;;  %p54_p2 = scmp.eq.s32.totalorder %s2060_s19, 0 }
  0x75   : > { %s2765_s16 = smov (%p37_p3, %s36_s16), 0  ;;  %s2767_s12 = smov (!%p37_p3, %s39_s12), %s2056_s18 }
  0x76   : > { %s238_s5 = ssub.s32 %s2052_s17, %s2765_s16  ;;  %p41_p9 = scmp.ge.s32.totalorder %s2767_s12, 2 }
  0x77   : > { %p1665_p5 = scmp.lt.s32.totalorder %s2060_s19, 4  ;;  %p2320_p13 = por %p54_p2, %p53_p11 }
  0x78   : > { %s333_s6 = sand.u32 1, %s2040_s14   ;;  %s2769_s12 = smov (%p41_p9, %s2767_s12), 0 }
  0x79   : > { %s1446_s25 = sshll.u32 %s333_s6, 4  ;;  %s43_s28 = ssub.s32 %s2056_s18, %s2769_s12 }
  0x7a   : > { %p44_p6 = scmp.eq.s32.totalorder %s43_s28, 0  ;;  %s239_s20 = sor.u32 %s238_s5, %s43_s28 }
  0x7b   : > { %p240_p8 = scmp.eq.s32.totalorder %s239_s20, 0  ;;  %s1493_s23 = sshll.u32 %s2056_s18, 8 }
  0x7c   : > { %s2331_s8 = scalar_select %p44_p6, %s2040_s14, %s46_s4  }
  0x7d   : > { %s2732_s29 = sadd.s32 1, %s2028_s11  ;;  %s2341_s30 = scalar_lea.hbm %s2686_s0, %s1493_s23 }
  0x7e   : > { %s2336_s21 = scalar_select %p240_p8, %s2028_s11, %s2732_s29  }
  0x7f   : > { %s337_s1 = scalar_lea.vmem [#allocation4], %s1446_s25  ;;  %p2349_p10 = pnand %p1665_p5, %p2320_p13 }
  0x80   : > { %s344_s3 = sshll.u32 %s337_s1, 4  ;;  %s2353_s5 = scalar_lea.sflag [#allocation5], %s333_s6  ;;  %s2343_s3 = int_to_ptr.vmem [resolvable:$true] %s344_s3 }
  0x81   : > { %s1900_s9 = scalar_lea.hbm %s2341_s30, 256  ;;  %p1902_p0 = pneg %p2349_p10 }
  0x82   : > { %p1901_p12 = scmp.ne.s32.totalorder %s2341_s30, %s1900_s9  ;;  %s1905_s26 = scalar_lea.hbm %s2686_s0, 512 }
  0x83   : > { %p1906_p7 = scmp.lt.u32.totalorder %s2341_s30, %s2686_s0  ;;  %p1907_p3 = scmp.lt.u32.totalorder %s1905_s26, %s1900_s9 }
  0x84   : > { %p1903_p4 = pnand %p1902_p0, %p1901_p12  ;;  %p1909_p2 = scmp.lt.u32.totalorder %s1900_s9, %s2341_s30 }
  0x85   : > { %p1908_p11 = por %p1907_p3, %p1906_p7 }
  0x86   : > { %p1904_p1 = pneg %p1903_p4 }
  0x87   : > { %p1910_p9 = por %p1909_p2, %p1908_p11 }
  0x89   : > { %p1911_p5 = pnand %p1910_p9, %p1904_p1 }
  0x8b   : > { %1914 = shalt.err (!%p1911_p5)
}
  0x8c   : > { %s1915_s6 = scalar_lea.vmem %s2343_s3, 256  ;;  %s2067_s23 = smov [#allocation4]  }
  0x8d   : > { %p1916_p13 = scmp.ne.s32.totalorder %s2343_s3, %s1915_s6  ;;  %s1920_s29 = sshll.u32 %s2067_s23, 4  ;;  %s1921_s29 = int_to_ptr.vmem [resolvable:$false] %s1920_s29 }
  0x8e   : > { %s1922_s2 = scalar_lea.vmem %s1921_s29, 512  ;;  %p1923_p12 = scmp.lt.s32.totalorder %s2343_s3, %s1921_s29 }
  0x8f   : > { %p1918_p6 = pnand %p1916_p13, %p1902_p0  ;;  %p1924_p4 = scmp.lt.s32.totalorder %s1922_s2, %s1915_s6 }
  0x91   : > { %p1919_p8 = pneg %p1918_p6  ;;  %p1925_p7 = por %p1924_p4, %p1923_p12 }
  0x93   : > { %p1926_p3 = pnand %p1925_p7, %p1919_p8 }
  0x95   : > { %1929 = shalt.err (!%p1926_p3)
}
  0x96   : > { %s2734_s9 = smov 4   ;;  %s2735_s1 = smov 64  }
  0x97   : > { %1657 = dma.hbm_to_vmem [thread:$0]  (!%p2349_p10), %s2341_s30, 256, %s2343_s3, %s2353_s5, %s2735_s1, %s2735_s1, %s2734_s9  }
  0x98   : > { %p2736_p0 = scmp.ne.s32.totalorder %s2726_s27, 0 }
  0x99   : > { %s358_s25 = sand.u32 (!%p2736_p0), 1, %s2036_s13   ;;  %p2737_p1 = scmp.ne.s32.totalorder (!%p2736_p0), %s2721_s24, 0 }
  0x9a   : > { %356 = sbr.rel (%p2736_p0) target bundleno = 2749 (0xabd), region = 56  ;;  %s1450_s26 = sshll.u32 (!%p2736_p0), %s358_s25, 4 }
  0x9b   : > { %s359_s28 = scalar_lea.sflag (!%p2736_p0), [#allocation5], %s358_s25  ;;  %s2387_s20 = scalar_lea.vmem (!%p2736_p0), [#allocation4], %s1450_s26 }
  0xa1   : > { %2003 = dma.done.wait (%p2737_p1), %s359_s28, 256  }
  0xa2   : > { %2005 = vsyncadd (%p2737_p1), %s359_s28, 4294967040  ;;  %p2738_p11 = scmp.ne.s32.totalorder %s2720_s22, 0 }
  0xa4   : > { %2007 = dma.done.wait (%p2738_p11), [#allocation8], 512  }
  0xa5   : > { %2009 = vsyncadd (%p2738_p11), [#allocation8], 4294966784 }
  0xa6   : > { %2011 = dma.done.wait (%p2738_p11), [#allocation11], 256  }
  0xa7   : > { %2013 = vsyncadd (%p2738_p11), [#allocation11], 4294967040  ;;  %s406_s3 = sand.u32 1, %s2024_s10   ;;  %p1455_p10 = scmp.ne.s32.totalorder %s2044_s15, 0 }
  0xa8   : > { %s1454_s27 = sshll.u32 %s406_s3, 4  ;;  %v1773_v0 = vld [vmem:[#allocation9] sm:$0xff] (!%p1455_p10)   ;;  %s2739_s5 = sld [smem:[#allocation25_spill]] (!%p1455_p10)  ;;  %v1775_v2 = vld [vmem:[#allocation9 + $0x8] sm:$0xff] (!%p1455_p10)   ;;  %vm452_vm0 = vcmask (!%p1455_p10), 261120  }
  0xa9   : > { %s2404_s30 = scalar_lea.vmem [#allocation12], %s1454_s27  ;;  %414 = sbr.rel (%p1455_p10) target bundleno = 403 (0x193), region = 76  ;;  %1532 = vmatprep.subr.bf16.mxu0 (!%p1455_p10), %v1773_v0  ;;  %v1777_v4 = vld [vmem:[%s2387_s20] sm:$0xff] (!%p1455_p10)   ;;  %v1778_v5 = vld [vmem:[%s2387_s20 + $0x8] sm:$0xff] (!%p1455_p10)  }
  0xaa   : > { %1533 = vmatpush3.bf16.msra.mxu0 (!%p1455_p10), %v1773_v0  ;;  %1536 = vmatprep.mubr.msk.bf16.mxu0 (!%p1455_p10), %vm452_vm0, %v1777_v4  ;;  %s2740_s2 = sld [smem:[#allocation24_spill]] (!%p1455_p10)  ;;  %s2741_s25 = sld [smem:[#allocation26_spill]] (!%p1455_p10) }
  0xab   : > { %1534 = vmatprep.subr.bf16.mxu0 (!%p1455_p10), %v1775_v2  ;;  %1544 = vmatprep.mubr.msk.bf16.mxu1 (!%p1455_p10), %vm452_vm0, %v1777_v4 }
  0xae   : > { %v1774_v1 = vld [vmem:[%s2739_s5] sm:$0xff] (!%p1455_p10)   ;;  %v1776_v3 = vld [vmem:[%s2739_s5 + $0x8] sm:$0xff] (!%p1455_p10)   ;;  %1535 = vmatpush3.bf16.msra.mxu0 (!%p1455_p10), %v1775_v2 }
  0xaf   : > { %1540 = vmatprep.subr.bf16.mxu1 (!%p1455_p10), %v1774_v1 }
  0xb0   : > { %1541 = vmatpush3.bf16.msra.mxu1 %v1774_v1  ;;  %v1456_v7 = vld [vmem:[%s2740_s2] ss:$0 sm:$0xff] }
  0xb1   : > { %1542 = vmatprep.subr.bf16.mxu1 %v1776_v3  ;;  %1537 = vmatmul.mubr.msk.bf16.vlgmr.msra.gmra.mrb[0].mxu0 %vm452_vm0, %v1778_v5  ;;  %v1463_v9 = vld [vmem:[%s2741_s25] ss:$0 sm:$0xff] }
  0xb4   : > { %1543 = vmatpush3.bf16.msra.mxu1 %v1776_v3 }
  0xb7   : > { %1545 = vmatmul.mubr.msk.bf16.vlgmr.msra.gmra.mrb[0].mxu1 %vm452_vm0, %v1778_v5 }
 0x184   : > { %v1538_v6 = vpop.f32.mrb[0].mxu0 }
 0x185   : > { %v493_v10 = vpop.f32.mrb[1].mxu0  ;;  %v502_v13 = vadd.f32 %v1538_v6, %v1456_v7 }
 0x186   : > { %v1539_v12 = vpop.f32.mrb[2].mxu0  ;;  %v494_v18 = vadd.f32 %v1456_v7, %v493_v10 }
 0x187   : > { %v505_v14 = vadd.f32 %v1539_v12, %v1456_v7  ;;  %v496_v16 = vpop.f32.mrb[3].mxu0 }
 0x188   : > { %v497_v20 = vadd.f32 %v1456_v7, %v496_v16 }
 0x189   : > { %v509_v23 = vpack.c.bf16 %v505_v14, %v502_v13 }
 0x18a   : > { %v1546_v8 = vpop.f32.mrb[0].mxu1  ;;  %v508_v26 = vpack.c.bf16 %v497_v20, %v494_v18 }
 0x18b   : > { %v569_v11 = vpop.f32.mrb[1].mxu1  ;;  %v578_v17 = vadd.f32 %v1546_v8, %v1463_v9  ;;  %511 = vst.msk [vmem:[#allocation2 + $0x8] sm:$0xff] %vm452_vm0, %v509_v23 }
 0x18c   : > { %v1547_v15 = vpop.f32.mrb[2].mxu1  ;;  %v570_v22 = vadd.f32 %v1463_v9, %v569_v11  ;;  %510 = vst.msk [vmem:[#allocation2] sm:$0xff] %vm452_vm0, %v508_v26 }
 0x18d   : > { %v581_v19 = vadd.f32 %v1547_v15, %v1463_v9  ;;  %v572_v21 = vpop.f32.mrb[3].mxu1 }
 0x18e   : > { %v573_v24 = vadd.f32 %v1463_v9, %v572_v21 }
 0x18f   : > { %v585_v25 = vpack.c.bf16 %v581_v19, %v578_v17 }
 0x190   : > { %v584_v27 = vpack.c.bf16 %v573_v24, %v570_v22 }
 0x191   : > { %587 = vst.msk [vmem:[#allocation3 + $0x8] sm:$0xff] %vm452_vm0, %v585_v25 }
 0x192   : > { %586 = vst.msk [vmem:[#allocation3] sm:$0xff] %vm452_vm0, %v584_v27 }
 0x193 PF: > { %v1779_v28 = vld [vmem:[#allocation7] sm:$0xff]   ;;  %v2068_v29 = vmov 0.0   ;;  %v1780_v30 = vld [vmem:[#allocation7 + $0x8] sm:$0xff]   ;;  %vm2069_vm1 = vmmov 0   ;;  %s1468_s26 = sshll.u32 %s2044_s15, 4  ;;  %vm685_vm2 = vcmask 64512   ;;  %v669_v44 = vlaneseq }
 0x194   : > { %1548 = vmatprep.subr.bf16.mxu0 %v2068_v29  ;;  %1556 = vmatprep.subr.bf16.mxu1 %v2068_v29  ;;  %v2434_v31 = vld [vmem:[#allocation2] sm:$0xff]  ;;  %s589_s28 = sshra.s32 %s1468_s26, 3  ;;  %vm623_vm3 = vcmask 261120   ;;  %v2449_v34 = vld [vmem:[#allocation2 + $0x8] sm:$0xff]  ;;  %s2742_s22 = sld [smem:[#allocation22_spill]]  ;;  %v672_v46 = vstv %s1468_s26  ;;  %vm1231_vm6 = vcmask 130048  }
 0x195   : > { %1549 = vmatpush3.bf16.msra.mxu0 %v1779_v28  ;;  %1552 = vmatprep.mubr.msk.bf16.mxu0 %vm2069_vm1, %v2068_v29  ;;  %v690_v32 = vsel %vm685_vm2, %v2434_v31, 0  ;;  %s1469_s27 = sshll.u32 %s589_s28, 2  ;;  %v693_v35 = vsel %vm685_vm2, %v2449_v34, 0  ;;  %s2070_s6 = smov 120   ;;  %v670_v45 = vshrl.u32 %v669_v44, 7  ;;  %v676_v49 = vand.u32 127, %v669_v44 }
 0x196   : > { %1550 = vmatprep.subr.bf16.mxu0 %v2068_v29  ;;  %1560 = vmatprep.mubr.msk.bf16.mxu1 %vm2069_vm1, %v2068_v29  ;;  %s592_s24 = scalar_lea.vmem %s2387_s20, %s1469_s27 [#allocation4]  ;;  %v2071_v51 = vmov -1e+09   ;;  %s2072_s23 = smov 112   ;;  %vm1234_vm7 = vcmask 195584  }
 0x197   : > { %1557 = vmatpush3.bf16.xpose.msra.mxu1 %v690_v32  ;;  %v1781_v33 = vld [vmem:[%s592_s24] sm:$0xff]   ;;  %813 = vrot.lane.b32.xlu1 %v2434_v31, %s2070_s6  ;;  %v671_v47 = vadd.s32 8, %v670_v45  ;;  %v673_v48 = vadd.s32 %v672_v46, %v670_v45  ;;  %s2073_s29 = smov 104   ;;  %s2709_s2 = smov 8  }
 0x198   : > { %1558 = vmatprep.subr.bf16.mxu1 %v2068_v29  ;;  %v2483_v63 = vld [vmem:[#allocation3 + $0x8] sm:$0xff]  ;;  %s2075_s9 = smov 16   ;;  %s2743_s1 = sld [smem:[#allocation18_spill]] }
 0x199   : > { %1551 = vmatpush3.bf16.msra.mxu0 %v1780_v30  ;;  %v674_v50 = vadd.s32 %v672_v46, %v671_v47  ;;  %vm677_vm4 = vcmp.le.s32.totalorder %v676_v49, %v673_v48  ;;  %v2477_v62 = vld [vmem:[#allocation3] sm:$0xff]  ;;  %s2076_s25 = smov 24   ;;  %s1488_s26 = sshll.u32 %s2044_s15, 1 }
 0x19a   : > { %1564 = vmatprep.subr.bf16.mxu0 %v2068_v29  ;;  %v1470_v36 = vld [vmem:[%s2742_s22] ss:$0 sm:$0xff]  ;;  %v2469_v52 = vsel %vm677_vm4, 0.0, %v2071_v51  ;;  %s2744_s4 = sld [smem:[#allocation27_spill]]  ;;  %s2745_s22 = sld [smem:[#allocation19_spill]] }
 0x19b   : > { %815 = vrot.lane.b32.xlu1 %v2449_v34, %s2070_s6  ;;  %vm678_vm5 = vcmp.le.s32.totalorder %v676_v49, %v674_v50  ;;  %s2624_s15 = scalar_lea.sflag [#allocation6], %s406_s3 }
 0x19c   : > { %1553 = vmatmul.mubr.msk.bf16.vlgmr.msra.gmra.mrb[0].mxu0 %vm623_vm3, %v1781_v33  ;;  %v2471_v54 = vsel %vm678_vm5, 0.0, %v2071_v51 }
 0x19d   : > { %1568 = vmatprep.mubr.msk.bf16.mxu0 %vm2069_vm1, %v2068_v29  ;;  %1565 = vmatpush3.bf16.msra.mxu0 %v2477_v62 }
 0x19e   : > { %1566 = vmatprep.subr.bf16.mxu0 %v2068_v29  ;;  %s1489_s28 = sshll.u32 %s2743_s1, 2 }
 0x19f   : > { %1559 = vmatpush3.bf16.xpose.msra.mxu1 %v693_v35  ;;  %888 = vrot.lane.b32.xlu1 %v2477_v62, %s2070_s6  ;;  %s1318_s27 = sadd.s32 %s1489_s28, %s1488_s26  ;;  %s2077_s26 = smov [#allocation12]  }
 0x1a0   : > { %1580 = vmatprep.subr.bf16.mxu1 %v2068_v29  ;;  %p2747_p9 = scmp.ne.s32.totalorder %s2745_s22, 0  ;;  %s1934_s28 = sshll.u32 %s2077_s26, 4  ;;  %s1935_s28 = int_to_ptr.vmem [resolvable:$false] %s1934_s28 }
 0x1a1   : > { %1567 = vmatpush3.bf16.msra.mxu0 %v2483_v63 }
 0x1a2   : > { %1572 = vmatprep.subr.bf16.mxu0 %v2068_v29 }
 0x209   : > { %v814_v6 = vpop.permute.xlu1 %813 }
 0x20a   : > { %v821_v9 = vsel %vm685_vm2, %v814_v6, 0 }
 0x20d   : > { %v816_v11 = vpop.permute.xlu1 %815 }
 0x20e   : > { %v824_v12 = vsel %vm685_vm2, %v816_v11, 0 }
 0x211   : > { %v889_v14 = vpop.permute.xlu1 %888 }
 0x26f   : > { %v661_v37 = vpop.f32.mrb[0].mxu0 }
 0x270   : > { %v1554_v38 = vpop.f32.mrb[1].mxu0  ;;  %v662_v40 = vadd.f32 %v1470_v36, %v661_v37 }
 0x271   : > { %v664_v39 = vpop.f32.mrb[2].mxu0 }
 0x272   : > { %v665_v41 = vadd.f32 %v1470_v36, %v664_v39  ;;  %v1555_v42 = vpop.f32.mrb[3].mxu0 }
 0x274   : > { %v2457_v43 = vpack.c.bf16 %v665_v41, %v662_v40 }
 0x276   : > { %1561 = vmatmul.mubr.msk.bf16.vlgmr.msra.gmra.mrb[0].mxu1 %vm685_vm2, %v2457_v43 }
 0x277   : > { %1584 = vmatprep.mubr.msk.bf16.mxu1 %vm2069_vm1, %v2068_v29  ;;  %1581 = vmatpush3.bf16.msra.mxu1 %v889_v14 }
 0x278   : > { %1582 = vmatprep.subr.bf16.mxu1 %v2068_v29 }
 0x349   : > { %v729_v53 = vpop.f32.mrb[0].mxu1 }
 0x34a   : > { %v730_v55 = vadd.f32 %v729_v53, %v2469_v52  ;;  %v1562_v56 = vpop.f32.mrb[1].mxu1 }
 0x34b   : > { %v732_v57 = vpop.f32.mrb[2].mxu1 }
 0x34c   : > { %v733_v58 = vadd.f32 %v732_v57, %v2471_v54  ;;  %v1563_v59 = vpop.f32.mrb[3].mxu1  ;;  %v736_v60 = vsel %vm623_vm3, %v730_v55, -inf }
 0x34d   : > { %737 = vmax.xlane.f32.xlu0 %v736_v60 }
 0x34e   : > { %v739_v61 = vsel %vm623_vm3, %v733_v58, -inf }
 0x351   : > { %740 = vmax.xlane.f32.xlu0 %v739_v61 }
 0x367   : > { %809 = vrot.lane.b32.xlu0 %v2457_v43, %s2070_s6 }
 0x3da   : > { %v738_v0 = vpop.xlane.xlu0 %737 }
 0x3db   : > { %v742_v1 = vsub.f32 %v730_v55, %v738_v0 }
 0x3dd   : > { %v744_v2 = vmul.f32 1.442695, %v742_v1 }
 0x3de   : > { %v741_v3 = vpop.xlane.xlu0 %740 }
 0x3df   : > { %v743_v4 = vsub.f32 %v733_v58, %v741_v3  ;;  %1784 = vpow2.f32 %v744_v2 }
 0x3e1   : > { %v746_v5 = vmul.f32 1.442695, %v743_v4 }
 0x3e2   : > { %v810_v13 = vpop.permute.xlu0 %809 }
 0x3e3   : > { %1786 = vpow2.f32 %v746_v5 }
 0x3e9   : > { %v2489_v7 = vpop.eup %1784 }
 0x3ed   : > { %v2491_v8 = vpop.eup %1786 }
 0x3ee   : > { %v754_v10 = vpack.c.bf16 %v2491_v8, %v2489_v7 }
 0x3f0   : > { %1569 = vmatmul.mubr.msk.bf16.vlgmr.msra.gmra.mrb[4].mxu0 %vm623_vm3, %v754_v10 }
 0x3f1   : > { %1573 = vmatpush3.bf16.xpose.msra.mxu0 %v821_v9  ;;  %1576 = vmatprep.mubr.msk.bf16.mxu0 %vm2069_vm1, %v2068_v29 }
 0x3f2   : > { %1574 = vmatprep.subr.bf16.mxu0 %v2068_v29 }
 0x3f9   : > { %1575 = vmatpush3.bf16.xpose.msra.mxu0 %v824_v12 }
 0x3fa   : > { %1596 = vmatprep.subr.bf16.mxu0 %v2068_v29 }
 0x400   : > { %1577 = vmatmul.mubr.msk.bf16.vlgmr.msra.gmra.mrb[8].mxu0 %vm685_vm2, %v810_v13 }
 0x401   : > { %1600 = vmatprep.mubr.msk.bf16.mxu0 %vm2069_vm1, %v2068_v29 }
 0x4c3   : > { %v2506_v15 = vpop.f32.mrb[4].mxu0 }
 0x4c4   : > { %v1570_v16 = vpop.f32.mrb[5].mxu0 }
 0x4c5   : > { %v2508_v17 = vpop.f32.mrb[6].mxu0 }
 0x4c6   : > { %v1571_v18 = vpop.f32.mrb[7].mxu0 }
 0x4d3   : > { %v860_v19 = vpop.f32.mrb[8].mxu0 }
 0x4d4   : > { %v861_v20 = vadd.f32 %v860_v19, %v2469_v52  ;;  %v1578_v21 = vpop.f32.mrb[9].mxu0 }
 0x4d5   : > { %v863_v22 = vpop.f32.mrb[10].mxu0 }
 0x4d6   : > { %v864_v23 = vadd.f32 %v863_v22, %v2471_v54  ;;  %v1579_v24 = vpop.f32.mrb[11].mxu0  ;;  %v867_v25 = vsel %vm623_vm3, %v861_v20, -inf }
 0x4d7   : > { %868 = vmax.xlane.f32.xlu1 %v867_v25 }
 0x4d8   : > { %v870_v26 = vsel %vm623_vm3, %v864_v23, -inf }
 0x4d9   : > { %871 = vmax.xlane.f32.xlu0 %v870_v26 }
 0x4e8   : > { %951 = vrot.lane.b32.xlu1 %v2434_v31, %s2072_s23 }
 0x4ec   : > { %953 = vrot.lane.b32.xlu1 %v2449_v34, %s2072_s23 }
 0x4ef   : > { %890 = vrot.lane.b32.xlu0 %v2483_v63, %s2070_s6  ;;  %s1490_s6 = sshll.u32 %s1318_s27, 7  ;;  %s1936_s27 = scalar_lea.vmem %s1935_s28, 512 }
 0x4f0   : > { %947 = vrot.lane.b32.xlu1 %v2457_v43, %s2072_s23 }
 0x4f4   : > { %1026 = vrot.lane.b32.xlu1 %v2477_v62, %s2072_s23 }
 0x564   : > { %v869_v27 = vpop.xlane.xlu1 %868 }
 0x565   : > { %v873_v28 = vsub.f32 %v861_v20, %v869_v27 }
 0x566   : > { %v872_v30 = vpop.xlane.xlu0 %871 }
 0x567   : > { %v875_v32 = vmul.f32 1.442695, %v873_v28  ;;  %v874_v33 = vsub.f32 %v864_v23, %v872_v30 }
 0x568   : > { %v952_v39 = vpop.permute.xlu1 %951 }
 0x569   : > { %v877_v35 = vmul.f32 1.442695, %v874_v33  ;;  %1788 = vpow2.f32 %v875_v32  ;;  %v959_v40 = vsel %vm685_vm2, %v952_v39, 0 }
 0x56a   : > { %v891_v36 = vpop.permute.xlu0 %890 }
 0x56b   : > { %1790 = vpow2.f32 %v877_v35  ;;  %1583 = vmatpush3.bf16.msra.mxu1 %v891_v36 }
 0x56c   : > { %1588 = vmatprep.subr.bf16.mxu1 %v2068_v29  ;;  %v954_v42 = vpop.permute.xlu1 %953 }
 0x56d   : > { %v962_v44 = vsel %vm685_vm2, %v954_v42, 0 }
 0x570   : > { %v948_v45 = vpop.permute.xlu1 %947 }
 0x573   : > { %v2525_v37 = vpop.eup %1788 }
 0x574   : > { %v1027_v46 = vpop.permute.xlu1 %1026 }
 0x575   : > { %v2527_v38 = vpop.eup %1790  ;;  %1597 = vmatpush3.bf16.msra.mxu0 %v1027_v46 }
 0x576   : > { %v885_v41 = vpack.c.bf16 %v2527_v38, %v2525_v37  ;;  %1598 = vmatprep.subr.bf16.mxu0 %v2068_v29 }
 0x578   : > { %1585 = vmatmul.mubr.msk.bf16.vlgmr.msra.gmra.mrb[4].mxu1 %vm623_vm3, %v885_v41 }
 0x579   : > { %1589 = vmatpush3.bf16.xpose.msra.mxu1 %v959_v40  ;;  %1592 = vmatprep.mubr.msk.bf16.mxu1 %vm2069_vm1, %v2068_v29 }
 0x57a   : > { %1590 = vmatprep.subr.bf16.mxu1 %v2068_v29 }
 0x581   : > { %1591 = vmatpush3.bf16.xpose.msra.mxu1 %v962_v44  ;;  %v748_v44 = vsel %vm623_vm3, %v2489_v7, 0.0 }
 0x582   : > { %1612 = vmatprep.subr.bf16.mxu1 %v2068_v29 }
 0x588   : > { %1593 = vmatmul.mubr.msk.bf16.vlgmr.msra.gmra.mrb[8].mxu1 %vm685_vm2, %v948_v45  ;;  %v751_v45 = vsel %vm623_vm3, %v2491_v8, 0.0 }
 0x589   : > { %1616 = vmatprep.mubr.msk.bf16.mxu1 %vm2069_vm1, %v2068_v29 }
 0x64b   : > { %v2542_v47 = vpop.f32.mrb[4].mxu1 }
 0x64c   : > { %v1586_v48 = vpop.f32.mrb[5].mxu1 }
 0x64d   : > { %v2544_v49 = vpop.f32.mrb[6].mxu1 }
 0x64e   : > { %v1587_v50 = vpop.f32.mrb[7].mxu1 }
 0x65b   : > { %v998_v51 = vpop.f32.mrb[8].mxu1 }
 0x65c   : > { %v999_v53 = vadd.f32 %v998_v51, %v2469_v52  ;;  %v1594_v55 = vpop.f32.mrb[9].mxu1 }
 0x65d   : > { %v1001_v56 = vpop.f32.mrb[10].mxu1 }
 0x65e   : > { %v1002_v57 = vadd.f32 %v1001_v56, %v2471_v54  ;;  %v1595_v58 = vpop.f32.mrb[11].mxu1  ;;  %v1005_v59 = vsel %vm623_vm3, %v999_v53, -inf }
 0x65f   : > { %1006 = vmax.xlane.f32.xlu1 %v1005_v59 }
 0x660   : > { %v1008_v60 = vsel %vm623_vm3, %v1002_v57, -inf }
 0x661   : > { %1009 = vmax.xlane.f32.xlu0 %v1008_v60 }
 0x670   : > { %1089 = vrot.lane.b32.xlu1 %v2434_v31, %s2073_s29 }
 0x674   : > { %1091 = vrot.lane.b32.xlu1 %v2449_v34, %s2073_s29 }
 0x677   : > { %1028 = vrot.lane.b32.xlu0 %v2483_v63, %s2072_s23  ;;  %s1321_s23 = sshll.u32 %s2404_s30, 4  ;;  %s2618_s23 = int_to_ptr.vmem [resolvable:$true] %s1321_s23 }
 0x678   : > { %1085 = vrot.lane.b32.xlu1 %v2457_v43, %s2073_s29  ;;  %s1930_s1 = scalar_lea.vmem %s2618_s23, 256  ;;  %p1937_p6 = scmp.lt.s32.totalorder %s2618_s23, %s1935_s28 }
 0x679   : > { %p1931_p2 = scmp.ne.s32.totalorder %s2618_s23, %s1930_s1  ;;  %p1938_p8 = scmp.lt.s32.totalorder %s1936_s27, %s1930_s1 }
 0x67b   : > { %p1932_p5 = pnand %p1931_p2, %p2747_p9  ;;  %p1939_p12 = por %p1938_p8, %p1937_p6 }
 0x67d   : > { %p1933_p13 = pneg %p1932_p5 }
 0x67f   : > { %p1940_p4 = pnand %p1939_p12, %p1933_p13 }
 0x6ec   : > { %v1007_v61 = vpop.xlane.xlu1 %1006 }
 0x6ed   : > { %v1011_v0 = vsub.f32 %v999_v53, %v1007_v61 }
 0x6ee   : > { %v1010_v1 = vpop.xlane.xlu0 %1009 }
 0x6ef   : > { %v1013_v2 = vmul.f32 1.442695, %v1011_v0  ;;  %v1012_v3 = vsub.f32 %v1002_v57, %v1010_v1  ;;  %v1782_v0 = vld [vmem:[#allocation10] sm:$0xff]   ;;  %v1783_v1 = vld [vmem:[#allocation10 + $0x8] sm:$0xff]  }
 0x6f0   : > { %v1090_v6 = vpop.permute.xlu1 %1089 }
 0x6f1   : > { %v1015_v4 = vmul.f32 1.442695, %v1012_v3  ;;  %1792 = vpow2.f32 %v1013_v2  ;;  %v1097_v9 = vsel %vm685_vm2, %v1090_v6, 0 }
 0x6f2   : > { %v1029_v5 = vpop.permute.xlu0 %1028 }
 0x6f3   : > { %1794 = vpow2.f32 %v1015_v4  ;;  %1599 = vmatpush3.bf16.msra.mxu0 %v1029_v5 }
 0x6f4   : > { %1604 = vmatprep.subr.bf16.mxu0 %v2068_v29  ;;  %v1092_v43 = vpop.permute.xlu1 %1091 }
 0x6f5   : > { %v1100_v11 = vsel %vm685_vm2, %v1092_v43, 0 }
 0x6f8   : > { %v1086_v12 = vpop.permute.xlu1 %1085 }
 0x6fb   : > { %v1793_v31 = vpop.eup %1792 }
 0x6fc   : > { %v1017_v27 = vsel %vm623_vm3, %v1793_v31, 0.0 }
 0x6fd   : > { %v1795_v34 = vpop.eup %1794 }
 0x6fe   : > { %v1023_v10 = vpack.c.bf16 %v1795_v34, %v1793_v31  ;;  %v1020_v28 = vsel %vm623_vm3, %v1795_v34, 0.0 }
 0x700   : > { %1601 = vmatmul.mubr.msk.bf16.vlgmr.msra.gmra.mrb[12].mxu0 %vm623_vm3, %v1023_v10 }
 0x701   : > { %1605 = vmatpush3.bf16.xpose.msra.mxu0 %v1097_v9  ;;  %1608 = vmatprep.mubr.msk.bf16.mxu0 %vm2069_vm1, %v2068_v29 }
 0x702   : > { %1606 = vmatprep.subr.bf16.mxu0 %v2068_v29 }
 0x709   : > { %1607 = vmatpush3.bf16.xpose.msra.mxu0 %v1100_v11 }
 0x710   : > { %1609 = vmatmul.mubr.msk.bf16.vlgmr.msra.gmra.mrb[16].mxu0 %vm685_vm2, %v1086_v12 }
 0x7d3   : > { %v2566_v13 = vpop.f32.mrb[12].mxu0 }
 0x7d4   : > { %v1602_v14 = vpop.f32.mrb[13].mxu0 }
 0x7d5   : > { %v2568_v16 = vpop.f32.mrb[14].mxu0 }
 0x7d6   : > { %v1603_v18 = vpop.f32.mrb[15].mxu0 }
 0x7e3   : > { %v1136_v19 = vpop.f32.mrb[16].mxu0 }
 0x7e4   : > { %v1137_v20 = vadd.f32 %v1136_v19, %v2469_v52  ;;  %v1610_v21 = vpop.f32.mrb[17].mxu0  ;;  %v879_v52 = vsel %vm623_vm3, %v2525_v37, 0.0 }
 0x7e5   : > { %v1139_v22 = vpop.f32.mrb[18].mxu0 }
 0x7e6   : > { %v1140_v23 = vadd.f32 %v1139_v22, %v2471_v54  ;;  %v1611_v24 = vpop.f32.mrb[19].mxu0  ;;  %v1143_v25 = vsel %vm623_vm3, %v1137_v20, -inf  ;;  %v882_v54 = vsel %vm623_vm3, %v2527_v38, 0.0  ;;  %v1483_v22 = vld [vmem:[%s2744_s4] ss:$0 sm:$0xff] }
 0x7e7   : > { %1144 = vmax.xlane.f32.xlu0 %v1143_v25 }
 0x7e8   : > { %v1146_v26 = vsel %vm623_vm3, %v1140_v23, -inf }
 0x7e9   : > { %1147 = vmax.xlane.f32.xlu1 %v1146_v26 }
 0x7fa   : > { %1166 = vrot.lane.b32.xlu1 %v2483_v63, %s2073_s29 }
 0x7fd   : > { %1164 = vrot.lane.b32.xlu0 %v2477_v62, %s2073_s29 }
 0x81c   : > { %880 = vadd.xlane.f32.xlu0 %v879_v52 }
 0x81e   : > { %883 = vadd.xlane.f32.xlu1 %v882_v54 }
 0x820   : > { %1018 = vadd.xlane.f32.xlu0 %v1017_v27 }
 0x824   : > { %1021 = vadd.xlane.f32.xlu0 %v1020_v28 }
 0x874   : > { %v1145_v30 = vpop.xlane.xlu0 %1144 }
 0x875   : > { %v1149_v32 = vsub.f32 %v1137_v20, %v1145_v30 }
 0x876   : > { %v1148_v63 = vpop.xlane.xlu1 %1147 }
 0x877   : > { %v1151_v33 = vmul.f32 1.442695, %v1149_v32  ;;  %v1150_v35 = vsub.f32 %v1140_v23, %v1148_v63 }
 0x878   : > { %v1165_v62 = vpop.permute.xlu0 %1164 }
 0x879   : > { %1796 = vpow2.f32 %v1151_v33  ;;  %v1153_v36 = vmul.f32 1.442695, %v1150_v35  ;;  %1613 = vmatpush3.bf16.msra.mxu1 %v1165_v62 }
 0x87a   : > { %1614 = vmatprep.subr.bf16.mxu1 %v2068_v29  ;;  %v1167_v37 = vpop.permute.xlu1 %1166 }
 0x87b   : > { %1798 = vpow2.f32 %v1153_v36 }
 0x87d   : > { %1615 = vmatpush3.bf16.msra.mxu1 %v1167_v37 }
 0x87e   : > { %1620 = vmatprep.subr.bf16.mxu1 %v2068_v29 }
 0x883   : > { %v1797_v38 = vpop.eup %1796 }
 0x884   : > { %v1155_v39 = vsel %vm623_vm3, %v1797_v38, 0.0 }
 0x885   : > { %v1799_v40 = vpop.eup %1798  ;;  %1156 = vadd.xlane.f32.xlu1 %v1155_v39 }
 0x886   : > { %v1158_v41 = vsel %vm623_vm3, %v1799_v40, 0.0  ;;  %v1161_v42 = vpack.c.bf16 %v1799_v40, %v1797_v38 }
 0x887   : > { %1159 = vadd.xlane.f32.xlu0 %v1158_v41 }
 0x888   : > { %1617 = vmatmul.mubr.msk.bf16.vlgmr.msra.gmra.mrb[12].mxu1 %vm623_vm3, %v1161_v42 }
 0x889   : > { %749 = vadd.xlane.f32.xlu1 %v748_v44  ;;  %1624 = vmatprep.mubr.msk.bf16.mxu1 %vm2069_vm1, %v2068_v29 }
 0x88a   : > { %1621 = vmatpush3.bf16.msra.mxu1 %v1782_v0 }
 0x88b   : > { %752 = vadd.xlane.f32.xlu0 %v751_v45  ;;  %1622 = vmatprep.subr.bf16.mxu1 %v2068_v29 }
 0x88e   : > { %1623 = vmatpush3.bf16.msra.mxu1 %v1783_v1 }
 0x8a9   : > { %v881_v46 = vpop.xlane.xlu0 %880 }
 0x8aa   : > { %1800 = vrcp.f32 %v881_v46 }
 0x8ab   : > { %v884_v48 = vpop.xlane.xlu1 %883 }
 0x8ac   : > { %1802 = vrcp.f32 %v884_v48 }
 0x8ad   : > { %v1019_v50 = vpop.xlane.xlu0 %1018 }
 0x8ae   : > { %1804 = vrcp.f32 %v1019_v50 }
 0x8b1   : > { %v1022_v51 = vpop.xlane.xlu0 %1021 }
 0x8b2   : > { %1806 = vrcp.f32 %v1022_v51 }
 0x8b4   : > { %v1801_v53 = vpop.eup %1800 }
 0x8b5   : > { %v940_v7 = vmul.f32 %v1801_v53, %v2542_v47 }
 0x8b6   : > { %v1803_v55 = vpop.eup %1802 }
 0x8b7   : > { %v941_v56 = vmul.f32 %v1803_v55, %v2544_v49 }
 0x8b8   : > { %v1805_v58 = vpop.eup %1804 }
 0x8b9   : > { %v942_v57 = vpack.c.bf16 %v941_v56, %v940_v7  ;;  %v1078_v59 = vmul.f32 %v1805_v58, %v2566_v13 }
 0x8bb   : > { %1220 = vrot.lane.b32.xlu1 %v942_v57, %s2709_s2 }
 0x8bc   : > { %v1807_v8 = vpop.eup %1806 }
 0x8bd   : > { %v1079_v60 = vmul.f32 %v1807_v8, %v2568_v16 }
 0x8bf   : > { %v1080_v61 = vpack.c.bf16 %v1079_v60, %v1078_v59 }
 0x8c1   : > { %1223 = vrot.lane.b32.xlu0 %v1080_v61, %s2075_s9 }
 0x912   : > { %v1157_v47 = vpop.xlane.xlu1 %1156 }
 0x914   : > { %v1160_v49 = vpop.xlane.xlu0 %1159 }
 0x916   : > { %v750_v2 = vpop.xlane.xlu1 %749 }
 0x917   : > { %1808 = vrcp.f32 %v750_v2 }
 0x918   : > { %v753_v3 = vpop.xlane.xlu0 %752 }
 0x919   : > { %1810 = vrcp.f32 %v753_v3 }
 0x91a   : > { %1812 = vrcp.f32 %v1157_v47 }
 0x91b   : > { %1814 = vrcp.f32 %v1160_v49 }
 0x921   : > { %v1809_v4 = vpop.eup %1808 }
 0x922   : > { %v801_v31 = vmul.f32 %v1809_v4, %v2506_v15 }
 0x923   : > { %v1811_v5 = vpop.eup %1810 }
 0x924   : > { %v802_v34 = vmul.f32 %v1811_v5, %v2508_v17  ;;  %v1813_v10 = vpop.eup %1812 }
 0x925   : > { %v1815_v29 = vpop.eup %1814 }
 0x926   : > { %v803_v6 = vpack.c.bf16 %v802_v34, %v801_v31 }
 0x92d   : > { %v1221_v15 = vpop.permute.xlu1 %1220 }
 0x92e   : > { %v1230_v18 = vsel %vm685_vm2, %v803_v6, %v1221_v15 }
 0x933   : > { %v1224_v17 = vpop.permute.xlu0 %1223 }
 0x934   : > { %v1233_v19 = vsel %vm1231_vm6, %v1230_v18, %v1224_v17 }
 0x95b   : > { %v1207_v9 = vpop.f32.mrb[12].mxu1 }
 0x95c   : > { %v1618_v43 = vpop.f32.mrb[13].mxu1  ;;  %v1216_v12 = vmul.f32 %v1813_v10, %v1207_v9 }
 0x95d   : > { %v1210_v11 = vpop.f32.mrb[14].mxu1 }
 0x95e   : > { %v1217_v13 = vmul.f32 %v1815_v29, %v1210_v11  ;;  %v1619_v14 = vpop.f32.mrb[15].mxu1 }
 0x960   : > { %v1218_v16 = vpack.c.bf16 %v1217_v13, %v1216_v12 }
 0x962   : > { %1226 = vrot.lane.b32.xlu1 %v1218_v16, %s2076_s25  ;;  %s2746_s25 = sld [smem:[#allocation28_spill]] }
 0x968   : > { %s2614_s2 = scalar_lea.hbm %s2746_s25, %s1490_s6 }
 0x9d4   : > { %v1227_v20 = vpop.permute.xlu1 %1226 }
 0x9d5   : > { %v1236_v21 = vsel %vm1234_vm7, %v1233_v19, %v1227_v20 }
 0x9d6   : > { %1625 = vmatmul.mubr.msk.bf16.vlgmr.msra.gmra.mrb[16].mxu1 %vm623_vm3, %v1236_v21 }
 0xaa9   : > { %v1296_v23 = vpop.f32.mrb[16].mxu1 }
 0xaaa   : > { %v1297_v24 = vadd.f32 %v1483_v22, %v1296_v23  ;;  %v1626_v25 = vpop.f32.mrb[17].mxu1 }
 0xaab   : > { %v1299_v26 = vpop.f32.mrb[18].mxu1 }
 0xaac   : > { %1303 = vst.msk [vmem:[%s2404_s30] sm:$0xff] %vm623_vm3, %v1297_v24  ;;  %v1300_v52 = vadd.f32 %v1483_v22, %v1299_v26  ;;  %v1627_v54 = vpop.f32.mrb[19].mxu1 }
 0xaae   : > { %1304 = vst.msk [vmem:[%s2404_s30 + $0x8] sm:$0xff] %vm623_vm3, %v1300_v52 }
 0xaaf   : > { %1943 = shalt.err (!%p1940_p4)
}
 0xab0   : > { %s1944_s3 = scalar_lea.hbm %s2614_s2, 256  ;;  %s1948_s20 = scalar_lea.hbm %s2746_s25, 1024 }
 0xab1   : > { %p1945_p7 = scmp.ne.s32.totalorder %s2614_s2, %s1944_s3  ;;  %p1949_p1 = scmp.lt.u32.totalorder %s2614_s2, %s2746_s25 }
 0xab2   : > { %p1950_p11 = scmp.lt.u32.totalorder %s1948_s20, %s1944_s3  ;;  %p1952_p2 = scmp.lt.u32.totalorder %s1944_s3, %s2614_s2 }
 0xab3   : > { %p1946_p3 = pnand %p1945_p7, %p2747_p9 }
 0xab4   : > { %p1951_p10 = por %p1950_p11, %p1949_p1 }
 0xab5   : > { %p1947_p0 = pneg %p1946_p3 }
 0xab6   : > { %p1953_p5 = por %p1952_p2, %p1951_p10 }
 0xab8   : > { %p1954_p13 = pnand %p1953_p5, %p1947_p0 }
 0xaba   : > { %1957 = shalt.err (!%p1954_p13)
}
 0xabb   : > { %s2078_s29 = smov 128   ;;  %s2748_s9 = smov 8  }
 0xabc   : > { %1642 = dma.vmem_to_hbm [thread:$0]  (%p2747_p9), %s2618_s23, 256, %s2614_s2, %s2624_s15, %s2078_s29, %s2078_s29, %s2748_s9  }
 0xabd PF: > { %s2749_s1 = sld [smem:[#allocation17_spill]]  ;;  %s2750_s26 = sld [smem:[#allocation20_spill]] }
 0xabe   : > { %p1669_p6 = scmp.ge.s32.totalorder %s2060_s19, 2 }
 0xac3   : > { %s1336_s28 = sand.u32 1, %s2749_s1   ;;  %p2751_p8 = scmp.ne.s32.totalorder %s2750_s26, 0 }
 0xac4   : > { %s1337_s27 = scalar_lea.sflag [#allocation6], %s1336_s28 }
 0xac5   : > { %p1659_p12 = pnand %p1669_p6, %p2751_p8 }
 0xac7   : > { %2015 = dma.done.wait (!%p1659_p12), %s1337_s27, 256  }
 0xac8   : > { %2017 = vsyncadd (!%p1659_p12), %s1337_s27, 4294967040  ;;  %s27_s19 = sadd.s32 1, %s2060_s19   ;;  %s2752_s2 = smov %s2765_s16 }
 0xac9   : > { %p24_p4 = scmp.ge.s32.totalorder %s27_s19, 6   ;;  %s2753_s22 = smov %s2769_s12 }
 0xaca   : > { %s2754_s30 = smov %s2024_s10  ;;  %s2755_s10 = smov %s2028_s11 }
 0xacb   : > { %s2756_s11 = smov %s2336_s21  ;;  %s2757_s12 = smov %s2036_s13 }
 0xacc   : > { %s2758_s13 = smov %s2040_s14  ;;  %s2759_s14 = smov %s2331_s8 }
 0xacd   : > { %s2760_s15 = smov %s2052_s17  ;;  %s2761_s16 = smov %s2056_s18 }
 0xace   : > { %s2762_s17 = smov %s2752_s2  ;;  %s2763_s18 = smov %s2753_s22 }
 0xacf   :  { %26 = sbr.rel (!%p24_p4) target bundleno = 20 (0x14), region = 118 }
 0xad6   :  { %1342 = vsyncpa [#allocation5], 1 }
 0xad7   :  { %1344 = vsyncpa [#allocation5 + $0x1], 1 }
 0xad8   :  { %1345 = vsyncpa [#allocation8], 1 }
 0xad9   :  { %1346 = vsyncpa [#allocation11], 1 }
 0xada   :  { %1347 = vsyncpa [#allocation6], 1 }
 0xadb   :  { %1349 = vsyncpa [#allocation6 + $0x1], 1 }

</bundles_post_ra>
